<compile_context>
chip_gen: v7x
topology: tpu7x:2x2x1
jax: 0.10.0
libtpu: 0.0.40
codegen_flags: <defaults>
</compile_context>

<pallas_src>
import functools

import jax
import jax.numpy as jnp
from jax.experimental import pallas as pl
from jax.experimental.pallas import tpu as pltpu


# ----------------------------- problem sizes -----------------------------
N_IN = 8                       # "y" features (x has N_IN + 1 columns, last = dt)
HID = 32                       # hidden width of every MLP
N_OUT = 4
N_NEURON = 8
BT_DIM = N_OUT * N_NEURON      # branch / trunk output width = 32
OUT_PAD = 8                    # kernel output lane width (N_OUT padded to 8 -> 32 B rows)
TILE_B = 1024                  # default rows per grid step (8-row aligned)

assert HID == BT_DIM, "trunk slab packing below assumes HID == N_OUT * N_NEURON"

# Trunk slab row layout: every section starts on an 8-row (sublane-tile) boundary.
TR_WT2 = 0              # rows [0, HID)      : trunk layer-2 weight [HID, BT_DIM]
TR_WT1 = HID            # row  HID           : trunk layer-1 weight [1, HID]
TR_BT1 = HID + 8        # row  HID + 8       : trunk layer-1 bias   [1, HID]
TR_BT2 = HID + 16       # row  HID + 16      : trunk layer-2 bias   [1, BT_DIM]
TR_ROWS = HID + 24


# ------------------------------- kernel ----------------------------------
def deeponet_shift_kernel(x_ref, l1_ref, l2_ref, tr_ref, mask_ref, out_ref):
    f32 = jnp.float32
    x = x_ref[...]                                   # [TILE, N_IN + 1]
    y = x[:, :N_IN]                                  # [TILE, N_IN]
    dt = x[:, N_IN:N_IN + 1]                         # [TILE, 1]

    # ---- fused shift|branch layer 1: one [N_IN, 2*HID] matmul ----
    w1 = l1_ref[:N_IN, :]                            # [N_IN, 2*HID]
    b1 = l1_ref[N_IN:N_IN + 1, :]                    # [1, 2*HID]
    h1 = jnp.tanh(jnp.dot(y, w1, preferred_element_type=f32) + b1)

    # ---- fused shift|branch layer 2: block-diagonal [2*HID, 1+BT_DIM] matmul ----
    w2 = l2_ref[:2 * HID, :]                         # [2*HID, 1 + BT_DIM]
    b2 = l2_ref[2 * HID:2 * HID + 1, :]              # [1, 1 + BT_DIM]
    sb = jnp.tanh(jnp.dot(h1, w2, preferred_element_type=f32) + b2)
    s = sb[:, :1]                                    # shift output  [TILE, 1]
    br = sb[:, 1:]                                   # branch output [TILE, BT_DIM]

    # ---- trunk (8-row-aligned slab slices) ----
    wt2 = tr_ref[TR_WT2:TR_WT2 + HID, :]             # [HID, BT_DIM]
    wt1 = tr_ref[TR_WT1:TR_WT1 + 1, :]               # [1, HID]
    bt1 = tr_ref[TR_BT1:TR_BT1 + 1, :]               # [1, HID]
    bt2 = tr_ref[TR_BT2:TR_BT2 + 1, :]               # [1, BT_DIM]

    dt_s = dt + s                                    # [TILE, 1]
    # K=1 "matmul" as a VPU broadcast multiply-add (off the MXU serial chain).
    t1 = jnp.tanh(dt_s * wt1 + bt1)                  # [TILE, HID]
    t = jnp.tanh(jnp.dot(t1, wt2, preferred_element_type=f32) + bt2)  # [TILE, BT_DIM]

    # ---- grouped reduction as a constant-mask matmul, directly at 8 lanes ----
    out_ref[...] = jnp.dot(br * t, mask_ref[...], preferred_element_type=f32)


# ------------------------------- wrapper ----------------------------------
def pack_params(p):
    """Pack the 12 weight/bias tensors into 4 slabs (done once, outside the kernel)."""
    f32 = jnp.float32

    # Slab 1: fused shift|branch layer-1, [N_IN + 1, 2*HID].
    w1 = jnp.concatenate([p["ws1"], p["wb1"]], axis=1)
    b1 = jnp.concatenate([p["bs1"], p["bb1"]], axis=1)
    l1 = jnp.concatenate([w1, b1], axis=0).astype(f32)

    # Slab 2: block-diagonal shift|branch layer-2 + biases, [2*HID + 1, 1 + BT_DIM].
    w2 = jnp.zeros((2 * HID, 1 + BT_DIM), f32)
    w2 = w2.at[:HID, :1].set(p["ws2"])
    w2 = w2.at[HID:, 1:].set(p["wb2"])
    b2 = jnp.concatenate([p["bs2"], p["bb2"]], axis=1)
    l2 = jnp.concatenate([w2, b2], axis=0).astype(f32)

    # Slab 3: trunk params, [TR_ROWS, BT_DIM], each section on an 8-row boundary.
    tr = jnp.zeros((TR_ROWS, BT_DIM), f32)
    tr = tr.at[TR_WT2:TR_WT2 + HID, :].set(p["wt2"].astype(f32))
    tr = tr.at[TR_WT1:TR_WT1 + 1, :].set(p["wt1"].astype(f32))
    tr = tr.at[TR_BT1:TR_BT1 + 1, :].set(p["bt1"].astype(f32))
    tr = tr.at[TR_BT2:TR_BT2 + 1, :].set(p["bt2"].astype(f32))

    # Slab 4: 0/1 reduction mask at the narrow output width (N_OUT padded to 8).
    rows = jnp.arange(BT_DIM)
    mask = jnp.zeros((BT_DIM, OUT_PAD), f32).at[rows, rows // N_NEURON].set(1.0)

    return l1, l2, tr, mask


def _round_up(n, m):
    return ((n + m - 1) // m) * m


@functools.partial(jax.jit, static_argnames=("tile_b",))
def deeponet_shift(x, packed, tile_b=TILE_B):
    """x: [B, N_IN + 1] float32 ; packed: output of pack_params()."""
    l1, l2, tr, mask = packed
    batch = x.shape[0]

    # Cap the tile at tile_b rows, keep it 8-row aligned, and prefer >= 2 grid
    # steps so v7x's two TensorCores both get work when the batch allows it.
    tile = min(tile_b, max(8, _round_up(pl.cdiv(batch, 2), 8)))
    n_tiles = pl.cdiv(batch, tile)

    out = pl.pallas_call(
        deeponet_shift_kernel,
        out_shape=jax.ShapeDtypeStruct((batch, OUT_PAD), jnp.float32),
        grid=(n_tiles,),
        in_specs=[
            pl.BlockSpec((tile, N_IN + 1), lambda i: (i, 0)),            # x tile
            pl.BlockSpec((N_IN + 1, 2 * HID), lambda i: (0, 0)),         # resident weights
            pl.BlockSpec((2 * HID + 1, 1 + BT_DIM), lambda i: (0, 0)),
            pl.BlockSpec((TR_ROWS, BT_DIM), lambda i: (0, 0)),
            pl.BlockSpec((BT_DIM, OUT_PAD), lambda i: (0, 0)),
        ],
        out_specs=pl.BlockSpec((tile, OUT_PAD), lambda i: (i, 0)),
        compiler_params=pltpu.CompilerParams(
            dimension_semantics=("parallel",),
            vmem_limit_bytes=32 * 1024 * 1024,   # headroom above v5e's 16 MiB default
        ),
    )(x.astype(jnp.float32), l1, l2, tr, mask)

    # Columns N_OUT..OUT_PAD are identically zero by mask construction.
    return out[:, :N_OUT]


# --------------------------- init & reference ------------------------------
def init_params(key):
    """Deterministic parameter init; weights [in, out], biases [1, out]."""
    shapes = {
        # shift: N_IN -> HID -> 1
        "ws1": (N_IN, HID), "bs1": (1, HID),
        "ws2": (HID, 1),    "bs2": (1, 1),
        # branch: N_IN -> HID -> BT_DIM
        "wb1": (N_IN, HID), "bb1": (1, HID),
        "wb2": (HID, BT_DIM), "bb2": (1, BT_DIM),
        # trunk: 1 -> HID -> BT_DIM
        "wt1": (1, HID),    "bt1": (1, HID),
        "wt2": (HID, BT_DIM), "bt2": (1, BT_DIM),
    }
    params = {}
    for name, shp in sorted(shapes.items()):
        key, sub = jax.random.split(key)
        params[name] = (0.1 * jax.random.normal(sub, shp)).astype(jnp.float32)
    return params


def reference_forward(x, p):
    """Pure-JAX reference matching the PyTorch forward (unfused path)."""
    batch = x.shape[0]
    y = x[:, :N_IN]
    dt = x[:, N_IN:N_IN + 1]

    def mlp(h, w1, b1, w2, b2):
        h = jnp.tanh(h @ w1 + b1)
        return jnp.tanh(h @ w2 + b2)

    s = mlp(y, p["ws1"], p["bs1"], p["ws2"], p["bs2"])
    b = mlp(y, p["wb1"], p["bb1"], p["wb2"], p["bb2"])
    t = mlp(dt + s, p["wt1"], p["bt1"], p["wt2"], p["bt2"])
    b3 = b.reshape(batch, N_OUT, N_NEURON)
    t3 = t.reshape(batch, N_OUT, N_NEURON)
    return jnp.sum(b3 * t3, axis=2)


if __name__ == "__main__":
    key = jax.random.PRNGKey(0)
    key, kx = jax.random.split(key)

    # Batch chosen so the grid has 2 steps with a ragged (partial) last block,
    # exercising the unpadded boundary-block path.
    B_DEMO = 300
    x = jax.random.normal(kx, (B_DEMO, N_IN + 1), dtype=jnp.float32)

    params = init_params(key)
    packed = pack_params(params)

    out = deeponet_shift(x, packed)
    out = jax.block_until_ready(out)

    ref = reference_forward(x, params)
    assert out.shape == (B_DEMO, N_OUT), out.shape
    assert jnp.allclose(out, ref, atol=2e-5, rtol=1e-4), "mismatch vs reference"

    print("KERNEL_OK")
</pallas_src>

<mosaic_0001>
module attributes {stable_mosaic.version = 11 : i64} {
  func.func @deeponet_shift_kernel(%arg0: i32, %arg1: memref<152x9xf32, #tpu.memory_space<vmem>>, %arg2: memref<9x64xf32, #tpu.memory_space<vmem>>, %arg3: memref<65x33xf32, #tpu.memory_space<vmem>>, %arg4: memref<56x32xf32, #tpu.memory_space<vmem>>, %arg5: memref<32x8xf32, #tpu.memory_space<vmem>>, %arg6: memref<152x8xf32, #tpu.memory_space<vmem>>) attributes {dimension_semantics = [#tpu.dimension_semantics<parallel>], iteration_bounds = array<i64: 2>, scalar_prefetch = 0 : i64, scratch_operands = 0 : i64, tpu.core_type = #tpu.core_type<tc>, window_params = [{transform_indices = @transform_0, window_bounds = array<i64: 152, 9>}, {pipeline_mode = #tpu.pipeline_mode<synchronous>, transform_indices = @transform_1, window_bounds = array<i64: 9, 64>}, {pipeline_mode = #tpu.pipeline_mode<synchronous>, transform_indices = @transform_2, window_bounds = array<i64: 65, 33>}, {pipeline_mode = #tpu.pipeline_mode<synchronous>, transform_indices = @transform_3, window_bounds = array<i64: 56, 32>}, {pipeline_mode = #tpu.pipeline_mode<synchronous>, transform_indices = @transform_4, window_bounds = array<i64: 32, 8>}, {transform_indices = @transform_5, window_bounds = array<i64: 152, 8>}]} {
    %c0 = arith.constant 0 : index
    %c0_0 = arith.constant 0 : index
    %0 = vector.load %arg1[%c0, %c0_0] : memref<152x9xf32, #tpu.memory_space<vmem>>, vector<152x9xf32>
    %1 = vector.extract_strided_slice %0 {offsets = [0, 0], sizes = [152, 8], strides = [1, 1]} : vector<152x9xf32> to vector<152x8xf32>
    %2 = vector.extract_strided_slice %0 {offsets = [0, 8], sizes = [152, 1], strides = [1, 1]} : vector<152x9xf32> to vector<152x1xf32>
    %c0_1 = arith.constant 0 : index
    %c0_2 = arith.constant 0 : index
    %3 = vector.load %arg2[%c0_1, %c0_2] : memref<9x64xf32, #tpu.memory_space<vmem>>, vector<8x64xf32>
    %c8 = arith.constant 8 : index
    %c0_3 = arith.constant 0 : index
    %4 = vector.load %arg2[%c8, %c0_3] : memref<9x64xf32, #tpu.memory_space<vmem>>, vector<1x64xf32>
    %cst = arith.constant dense<0.000000e+00> : vector<152x64xf32>
    %5 = tpu.matmul %1, %3, %cst {dimension_numbers = #tpu.dot_dimension_numbers<[1], [0], [0], [1], [0, 0, 1, 1], [], []>} : vector<152x8xf32>, vector<8x64xf32>, vector<152x64xf32> -> vector<152x64xf32>
    %6 = vector.broadcast %4 : vector<1x64xf32> to vector<152x64xf32>
    %7 = arith.addf %5, %6 : vector<152x64xf32>
    %8 = math.tanh %7 : vector<152x64xf32>
    %c0_4 = arith.constant 0 : index
    %c0_5 = arith.constant 0 : index
    %9 = vector.load %arg3[%c0_4, %c0_5] : memref<65x33xf32, #tpu.memory_space<vmem>>, vector<64x33xf32>
    %c64 = arith.constant 64 : index
    %c0_6 = arith.constant 0 : index
    %10 = vector.load %arg3[%c64, %c0_6] : memref<65x33xf32, #tpu.memory_space<vmem>>, vector<1x33xf32>
    %cst_7 = arith.constant dense<0.000000e+00> : vector<152x33xf32>
    %11 = tpu.matmul %8, %9, %cst_7 {dimension_numbers = #tpu.dot_dimension_numbers<[1], [0], [0], [1], [0, 0, 1, 1], [], []>} : vector<152x64xf32>, vector<64x33xf32>, vector<152x33xf32> -> vector<152x33xf32>
    %12 = vector.broadcast %10 : vector<1x33xf32> to vector<152x33xf32>
    %13 = arith.addf %11, %12 : vector<152x33xf32>
    %14 = math.tanh %13 : vector<152x33xf32>
    %15 = vector.extract_strided_slice %14 {offsets = [0, 0], sizes = [152, 1], strides = [1, 1]} : vector<152x33xf32> to vector<152x1xf32>
    %16 = vector.extract_strided_slice %14 {offsets = [0, 1], sizes = [152, 32], strides = [1, 1]} : vector<152x33xf32> to vector<152x32xf32>
    %c0_8 = arith.constant 0 : index
    %c0_9 = arith.constant 0 : index
    %17 = vector.load %arg4[%c0_8, %c0_9] : memref<56x32xf32, #tpu.memory_space<vmem>>, vector<32x32xf32>
    %c32 = arith.constant 32 : index
    %c0_10 = arith.constant 0 : index
    %18 = vector.load %arg4[%c32, %c0_10] : memref<56x32xf32, #tpu.memory_space<vmem>>, vector<1x32xf32>
    %c40 = arith.constant 40 : index
    %c0_11 = arith.constant 0 : index
    %19 = vector.load %arg4[%c40, %c0_11] : memref<56x32xf32, #tpu.memory_space<vmem>>, vector<1x32xf32>
    %c48 = arith.constant 48 : index
    %c0_12 = arith.constant 0 : index
    %20 = vector.load %arg4[%c48, %c0_12] : memref<56x32xf32, #tpu.memory_space<vmem>>, vector<1x32xf32>
    %21 = arith.addf %2, %15 : vector<152x1xf32>
    %22 = vector.broadcast %21 : vector<152x1xf32> to vector<152x32xf32>
    %23 = vector.broadcast %18 : vector<1x32xf32> to vector<152x32xf32>
    %24 = arith.mulf %22, %23 : vector<152x32xf32>
    %25 = vector.broadcast %19 : vector<1x32xf32> to vector<152x32xf32>
    %26 = arith.addf %24, %25 : vector<152x32xf32>
    %27 = math.tanh %26 : vector<152x32xf32>
    %cst_13 = arith.constant dense<0.000000e+00> : vector<152x32xf32>
    %28 = tpu.matmul %27, %17, %cst_13 {dimension_numbers = #tpu.dot_dimension_numbers<[1], [0], [0], [1], [0, 0, 1, 1], [], []>} : vector<152x32xf32>, vector<32x32xf32>, vector<152x32xf32> -> vector<152x32xf32>
    %29 = vector.broadcast %20 : vector<1x32xf32> to vector<152x32xf32>
    %30 = arith.addf %28, %29 : vector<152x32xf32>
    %31 = math.tanh %30 : vector<152x32xf32>
    %32 = arith.mulf %16, %31 : vector<152x32xf32>
    %c0_14 = arith.constant 0 : index
    %c0_15 = arith.constant 0 : index
    %33 = vector.load %arg5[%c0_14, %c0_15] : memref<32x8xf32, #tpu.memory_space<vmem>>, vector<32x8xf32>
    %cst_16 = arith.constant dense<0.000000e+00> : vector<152x8xf32>
    %34 = tpu.matmul %32, %33, %cst_16 {dimension_numbers = #tpu.dot_dimension_numbers<[1], [0], [0], [1], [0, 0, 1, 1], [], []>} : vector<152x32xf32>, vector<32x8xf32>, vector<152x8xf32> -> vector<152x8xf32>
    %c0_17 = arith.constant 0 : index
    %c0_18 = arith.constant 0 : index
    %35 = vector.load %arg6[%c0_17, %c0_18] : memref<152x8xf32, #tpu.memory_space<vmem>>, vector<152x8xf32>
    tpu.vector_store %arg6[%c0_17, %c0_18], %34 {strides = array<i32>} : memref<152x8xf32, #tpu.memory_space<vmem>>, vector<152x8xf32>,
    return
  }
  func.func @transform_0(%arg0: i32) -> (i32, i32) {
    %c0_i32 = arith.constant 0 : i32
    %c0_i32_0 = arith.constant 0 : i32
    return %arg0, %c0_i32 : i32, i32
  }
  func.func @transform_1(%arg0: i32) -> (i32, i32) {
    %c0_i32 = arith.constant 0 : i32
    %c0_i32_0 = arith.constant 0 : i32
    %c0_i32_1 = arith.constant 0 : i32
    return %c0_i32, %c0_i32_0 : i32, i32
  }
  func.func @transform_2(%arg0: i32) -> (i32, i32) {
    %c0_i32 = arith.constant 0 : i32
    %c0_i32_0 = arith.constant 0 : i32
    %c0_i32_1 = arith.constant 0 : i32
    return %c0_i32, %c0_i32_0 : i32, i32
  }
  func.func @transform_3(%arg0: i32) -> (i32, i32) {
    %c0_i32 = arith.constant 0 : i32
    %c0_i32_0 = arith.constant 0 : i32
    %c0_i32_1 = arith.constant 0 : i32
    return %c0_i32, %c0_i32_0 : i32, i32
  }
  func.func @transform_4(%arg0: i32) -> (i32, i32) {
    %c0_i32 = arith.constant 0 : i32
    %c0_i32_0 = arith.constant 0 : i32
    %c0_i32_1 = arith.constant 0 : i32
    return %c0_i32, %c0_i32_0 : i32, i32
  }
  func.func @transform_5(%arg0: i32) -> (i32, i32) {
    %c0_i32 = arith.constant 0 : i32
    %c0_i32_0 = arith.constant 0 : i32
    return %arg0, %c0_i32 : i32, i32
  }
}

</mosaic_0001>

<bundles_post_ra>
// kernel: deeponet_shift.1
= control target key start
LH: loop header
LB: loop body
LE: loop exit
PB: predicated region body
PF: predicated region fallthrough
CT: control target
= control target key end

     0   :  { %s2359_s18 = smov 0   ;;  %s3066_s0 = inlined_call_operand.vmem [shape: f32[300,9], index: 0, kind: input, shape index: {}]   ;;  %s3067_s1 = inlined_call_operand.vmem [shape: f32[9,64], index: 1, kind: input, shape index: {}]   ;;  %s3068_s2 = inlined_call_operand.vmem [shape: f32[65,33], index: 2, kind: input, shape index: {}]   ;;  %s3069_s3 = inlined_call_operand.vmem [shape: f32[56,32], index: 3, kind: input, shape index: {}]   ;;  %s3070_s4 = inlined_call_operand.vmem [shape: f32[32,8], index: 4, kind: input, shape index: {}]   ;;  %s3071_s5 = inlined_call_operand.vmem [shape: f32[300,8], index: 5, kind: output, shape index: {}]  }
   0x1 LB: > { %s1672_s19 = sadd.s32 4294967295, %s2320_s18   ;;  %p1676_p0 = scmp.ge.s32.totalorder %s2320_s18, 1  ;;  %s2320_s18 = sphi %s2359_s18, %s15_s18  }
   0x2   : > { %p188_p1 = scmp.lt.s32.totalorder %s2320_s18, 3 }
   0x4   : > { %p189_p2 = pnand %p1676_p0, %p188_p1 }
   0x5   : > { %v247_v0 = vld [vmem:[%s3067_s1] sm:$0xff] (!%p189_p2)  ;;  %s216_s22 = smul.u32 (!%p189_p2), 19, %s1672_s19  ;;  %v2322_v1 = vmov (!%p189_p2), 0.0   ;;  %vm2323_vm0 = vmmov (!%p189_p2), 0   ;;  %v491_v3 = vld [vmem:[%s3068_s2 + $0x8] sm:$0xff] (!%p189_p2)  ;;  %v2324_v4 = vmov (!%p189_p2), 0.0|0.0  }
   0x6   : > { %192 = sbr.rel (%p189_p2) target bundleno = 1535 (0x5ff), region = 40  ;;  %1855 = vmatprep.subr.mxu0 (!%p189_p2), %v2322_v1  ;;  %1857 = vmatprep.mubr.msk.f32.mxu0 (!%p189_p2), %vm2323_vm0, %v2322_v1  ;;  %v490_v2 = vld [vmem:[%s3068_s2] sm:$0xff] (!%p189_p2)  ;;  %vm253_vm1 = vcmask (!%p189_p2), 64512   ;;  %v492_v25 = vld [vmem:[%s3068_s2 + $0x10] sm:$0xff] (!%p189_p2)  ;;  %v493_v26 = vld [vmem:[%s3068_s2 + $0x18] sm:$0xff] (!%p189_p2)  ;;  %vm503_vm2 = vcmask (!%p189_p2), 523264  }
   0x7   : > { %1856 = vmatpush3.msra.mxu0 (!%p189_p2), %v247_v0  ;;  %p217_p3 = scmp.lt.s32.totalorder (!%p189_p2), %s216_s22, 37  ;;  %2117 = vmatprep.subr.bf16.mxu1 (!%p189_p2), %v2324_v4  ;;  %v2118_v5 = vpack.c.bf16 (!%p189_p2), %v491_v3, %v490_v2  ;;  %v2121_v27 = vpack.c.bf16 (!%p189_p2), %v493_v26, %v492_v25  ;;  %v494_v28 = vld [vmem:[%s3068_s2 + $0x20] sm:$0xff] (!%p189_p2)  ;;  %v495_v29 = vld [vmem:[%s3068_s2 + $0x28] sm:$0xff] (!%p189_p2)  ;;  %v496_v31 = vld [vmem:[%s3068_s2 + $0x30] sm:$0xff] (!%p189_p2)  ;;  %s2326_s24 = smov (!%p189_p2), 8   ;;  %vm1006_vm3 = vcmask (!%p189_p2), 261120  }
   0x8   : > { %1930 = vmatprep.mubr.msk.f32.mxu1 (!%p189_p2), %vm2323_vm0, %v2322_v1  ;;  %2129 = vmatprep.subr.bf16.mxu0 (!%p189_p2), %v2324_v4  ;;  %v2124_v30 = vpack.c.bf16 (!%p189_p2), %v495_v29, %v494_v28  ;;  %v497_v32 = vld [vmem:[%s3068_s2 + $0x38] sm:$0xff] (!%p189_p2)  ;;  %v2551_v34 = vld [vmem:[%s3067_s1 + $0x8] ss:$0 sm:$0xff] (!%p189_p2)  ;;  %s2327_s15 = smov (!%p189_p2), 1   ;;  %s2328_s26 = smov (!%p189_p2), 127  }
   0x9   : > { %2119 = vmatpush3.bf16.msra.mxu1 (!%p189_p2), %v2118_v5  ;;  %v2127_v33 = vpack.c.bf16 (!%p189_p2), %v497_v32, %v496_v31 }
   0xa   : > { %2120 = vmatprep.subr.bf16.mxu1 (!%p189_p2), %v2324_v4 }
   0xd   : > { %s3073_s22 = smov (!%p217_p3, %s216_s22), 37  ;;  %2122 = vmatpush3.bf16.msra.mxu1 %v2121_v27 }
   0xe   : > { %s1677_s27 = sshll.u32 %s3073_s22, 3  ;;  %2123 = vmatprep.subr.bf16.mxu1 %v2324_v4 }
   0xf   : > { %s2392_s30 = scalar_lea.vmem %s3066_s0, %s1677_s27 }
  0x10   : > { %v2395_v6 = vld [vmem:[%s2392_s30] sm:$0xff]  ;;  %v2402_v7 = vld [vmem:[%s2392_s30 + $0x8] sm:$0xff]  ;;  %v2409_v8 = vld [vmem:[%s2392_s30 + $0x10] sm:$0xff] }
  0x11   : > { %1858 = vmatmul.mubr.msk.f32.vlgmr.msra.gmra.mrb[0].mxu0 %vm253_vm1, %v2395_v6  ;;  %v2416_v9 = vld [vmem:[%s2392_s30 + $0x18] sm:$0xff]  ;;  %v2423_v10 = vld [vmem:[%s2392_s30 + $0x20] sm:$0xff]  ;;  %v2430_v11 = vld [vmem:[%s2392_s30 + $0x28] sm:$0xff]  ;;  %2125 = vmatpush3.bf16.msra.mxu1 %v2124_v30 }
  0x12   : > { %1860 = vmatprep.mubr.msk.f32.mxu0 %vm2323_vm0, %v2322_v1  ;;  %v2437_v12 = vld [vmem:[%s2392_s30 + $0x30] sm:$0xff]  ;;  %v2444_v13 = vld [vmem:[%s2392_s30 + $0x38] sm:$0xff]  ;;  %v2451_v14 = vld [vmem:[%s2392_s30 + $0x40] sm:$0xff]  ;;  %2126 = vmatprep.subr.bf16.mxu1 %v2324_v4 }
  0x13   : > { %v2458_v15 = vld [vmem:[%s2392_s30 + $0x48] sm:$0xff]  ;;  %v2465_v16 = vld [vmem:[%s2392_s30 + $0x50] sm:$0xff]  ;;  %v2472_v17 = vld [vmem:[%s2392_s30 + $0x58] sm:$0xff] }
  0x14   : > { %v2479_v18 = vld [vmem:[%s2392_s30 + $0x60] sm:$0xff]  ;;  %v2486_v19 = vld [vmem:[%s2392_s30 + $0x68] sm:$0xff]  ;;  %v2493_v20 = vld [vmem:[%s2392_s30 + $0x70] sm:$0xff] }
  0x15   : > { %1861 = vmatmul.mubr.msk.f32.gmra.mrb[2].mxu0 %vm253_vm1, %v2402_v7  ;;  %v2500_v21 = vld [vmem:[%s2392_s30 + $0x78] sm:$0xff]  ;;  %v2507_v22 = vld [vmem:[%s2392_s30 + $0x80] sm:$0xff]  ;;  %v2514_v23 = vld [vmem:[%s2392_s30 + $0x88] sm:$0xff]  ;;  %2128 = vmatpush3.bf16.msra.mxu1 %v2127_v33 }
  0x16   : > { %1863 = vmatprep.mubr.msk.f32.mxu0 %vm2323_vm0, %v2322_v1  ;;  %v2521_v24 = vld [vmem:[%s2392_s30 + $0x90] sm:$0xff]  ;;  %2141 = vmatprep.subr.bf16.mxu1 %v2324_v4  ;;  %s3023_s30 = scalar_lea.vmem %s3071_s5, %s1677_s27 }
  0x19   : > { %1864 = vmatmul.mubr.msk.f32.gmra.mrb[4].mxu0 %vm253_vm1, %v2409_v8 }
  0x1a   : > { %1866 = vmatprep.mubr.msk.f32.mxu0 %vm2323_vm0, %v2322_v1 }
  0x1d   : > { %1867 = vmatmul.mubr.msk.f32.gmra.mrb[6].mxu0 %vm253_vm1, %v2416_v9 }
  0x1e   : > { %1869 = vmatprep.mubr.msk.f32.mxu0 %vm2323_vm0, %v2322_v1 }
  0x21   : > { %1870 = vmatmul.mubr.msk.f32.gmra.mrb[8].mxu0 %vm253_vm1, %v2423_v10 }
  0x22   : > { %1872 = vmatprep.mubr.msk.f32.mxu0 %vm2323_vm0, %v2322_v1 }
  0x25   : > { %1873 = vmatmul.mubr.msk.f32.gmra.mrb[10].mxu0 %vm253_vm1, %v2430_v11 }
  0x26   : > { %1875 = vmatprep.mubr.msk.f32.mxu0 %vm2323_vm0, %v2322_v1 }
  0x29   : > { %1876 = vmatmul.mubr.msk.f32.gmra.mrb[12].mxu0 %vm253_vm1, %v2437_v12 }
  0x2a   : > { %1878 = vmatprep.mubr.msk.f32.mxu0 %vm2323_vm0, %v2322_v1 }
  0x2d   : > { %1879 = vmatmul.mubr.msk.f32.gmra.mrb[14].mxu0 %vm253_vm1, %v2444_v13 }
  0x2e   : > { %1881 = vmatprep.mubr.msk.f32.mxu0 %vm2323_vm0, %v2322_v1 }
  0x31   : > { %1882 = vmatmul.mubr.msk.f32.gmra.mrb[16].mxu0 %vm253_vm1, %v2451_v14 }
  0x32   : > { %1884 = vmatprep.mubr.msk.f32.mxu0 %vm2323_vm0, %v2322_v1 }
  0x35   : > { %1885 = vmatmul.mubr.msk.f32.gmra.mrb[18].mxu0 %vm253_vm1, %v2458_v15 }
  0x36   : > { %1887 = vmatprep.mubr.msk.f32.mxu0 %vm2323_vm0, %v2322_v1 }
  0x39   : > { %1888 = vmatmul.mubr.msk.f32.gmra.mrb[20].mxu0 %vm253_vm1, %v2465_v16 }
  0x3a   : > { %1890 = vmatprep.mubr.msk.f32.mxu0 %vm2323_vm0, %v2322_v1 }
  0x3d   : > { %1891 = vmatmul.mubr.msk.f32.gmra.mrb[22].mxu0 %vm253_vm1, %v2472_v17 }
  0x3e   : > { %1893 = vmatprep.mubr.msk.f32.mxu0 %vm2323_vm0, %v2322_v1 }
  0x41   : > { %1894 = vmatmul.mubr.msk.f32.gmra.mrb[24].mxu0 %vm253_vm1, %v2479_v18 }
  0x42   : > { %1896 = vmatprep.mubr.msk.f32.mxu0 %vm2323_vm0, %v2322_v1 }
  0x45   : > { %1897 = vmatmul.mubr.msk.f32.gmra.mrb[26].mxu0 %vm253_vm1, %v2486_v19 }
  0x46   : > { %1899 = vmatprep.mubr.msk.f32.mxu0 %vm2323_vm0, %v2322_v1 }
  0x49   : > { %1900 = vmatmul.mubr.msk.f32.gmra.mrb[28].mxu0 %vm253_vm1, %v2493_v20 }
  0x4a   : > { %1902 = vmatprep.mubr.msk.f32.mxu0 %vm2323_vm0, %v2322_v1 }
  0x4d   : > { %1903 = vmatmul.mubr.msk.f32.gmra.mrb[30].mxu0 %vm253_vm1, %v2500_v21 }
  0x4e   : > { %1905 = vmatprep.mubr.msk.f32.mxu0 %vm2323_vm0, %v2322_v1 }
  0x51   : > { %1906 = vmatmul.mubr.msk.f32.gmra.mrb[32].mxu0 %vm253_vm1, %v2507_v22 }
  0x52   : > { %1908 = vmatprep.mubr.msk.f32.mxu0 %vm2323_vm0, %v2322_v1 }
  0x55   : > { %1909 = vmatmul.mubr.msk.f32.gmra.mrb[34].mxu0 %vm253_vm1, %v2514_v23 }
  0x56   : > { %1911 = vmatprep.mubr.msk.f32.mxu0 %vm2323_vm0, %v2322_v1 }
  0x59   : > { %1912 = vmatmul.mubr.msk.f32.gmra.mrb[36].mxu0 %vm253_vm1, %v2521_v24 }
  0x5a   : > { %1995 = vmatprep.mubr.msk.f32.mxu0 %vm2323_vm0, %v2322_v1 }
  0xe4   : > { %v377_v35 = vpop.f32.mrb[0].mxu0 }
  0xe5   : > { %v378_v36 = vadd.f32 %v2551_v34, %v377_v35  ;;  %v1859_v37 = vpop.f32.mrb[1].mxu0 }
  0xe7   : > { %2162 = vtanh.f32 %v378_v36 }
  0xe8   : > { %v382_v38 = vpop.f32.mrb[2].mxu0 }
  0xe9   : > { %v383_v39 = vadd.f32 %v2551_v34, %v382_v38  ;;  %v1862_v40 = vpop.f32.mrb[3].mxu0 }
  0xeb   : > { %2164 = vtanh.f32 %v383_v39 }
  0xec   : > { %v387_v41 = vpop.f32.mrb[4].mxu0 }
  0xed   : > { %v388_v42 = vadd.f32 %v2551_v34, %v387_v41  ;;  %v1865_v43 = vpop.f32.mrb[5].mxu0 }
  0xef   : > { %2166 = vtanh.f32 %v388_v42 }
  0xf0   : > { %v392_v44 = vpop.f32.mrb[6].mxu0 }
  0xf1   : > { %v2163_v45 = vpop.eup %2162  ;;  %v393_v46 = vadd.f32 %v2551_v34, %v392_v44  ;;  %v1868_v47 = vpop.f32.mrb[7].mxu0 }
  0xf2   : > { %1931 = vmatmul.mubr.msk.f32.vlgmr.msra.gmra.mrb[0].mxu1 %vm503_vm2, %v2163_v45 }
  0xf3   : > { %2168 = vtanh.f32 %v393_v46  ;;  %1933 = vmatprep.mubr.msk.f32.mxu1 %vm2323_vm0, %v2322_v1 }
  0xf4   : > { %v397_v48 = vpop.f32.mrb[8].mxu0 }
  0xf5   : > { %v2165_v49 = vpop.eup %2164  ;;  %v398_v50 = vadd.f32 %v2551_v34, %v397_v48  ;;  %v1871_v51 = vpop.f32.mrb[9].mxu0 }
  0xf6   : > { %1934 = vmatmul.mubr.msk.f32.gmra.mrb[2].mxu1 %vm503_vm2, %v2165_v49 }
  0xf7   : > { %2170 = vtanh.f32 %v398_v50  ;;  %1936 = vmatprep.mubr.msk.f32.mxu1 %vm2323_vm0, %v2322_v1 }
  0xf8   : > { %v402_v52 = vpop.f32.mrb[10].mxu0 }
  0xf9   : > { %v2167_v53 = vpop.eup %2166  ;;  %v403_v54 = vadd.f32 %v2551_v34, %v402_v52  ;;  %v1874_v55 = vpop.f32.mrb[11].mxu0 }
  0xfa   : > { %1937 = vmatmul.mubr.msk.f32.gmra.mrb[4].mxu1 %vm503_vm2, %v2167_v53 }
  0xfb   : > { %2172 = vtanh.f32 %v403_v54  ;;  %1939 = vmatprep.mubr.msk.f32.mxu1 %vm2323_vm0, %v2322_v1 }
  0xfc   : > { %v407_v56 = vpop.f32.mrb[12].mxu0 }
  0xfd   : > { %v2169_v57 = vpop.eup %2168  ;;  %v408_v58 = vadd.f32 %v2551_v34, %v407_v56  ;;  %v1877_v59 = vpop.f32.mrb[13].mxu0 }
  0xfe   : > { %1940 = vmatmul.mubr.msk.f32.gmra.mrb[6].mxu1 %vm503_vm2, %v2169_v57 }
  0xff   : > { %2174 = vtanh.f32 %v408_v58  ;;  %1942 = vmatprep.mubr.msk.f32.mxu1 %vm2323_vm0, %v2322_v1 }
 0x100   : > { %v412_v60 = vpop.f32.mrb[14].mxu0 }
 0x101   : > { %v2171_v61 = vpop.eup %2170  ;;  %v413_v62 = vadd.f32 %v2551_v34, %v412_v60  ;;  %v1880_v63 = vpop.f32.mrb[15].mxu0 }
 0x102   : > { %1943 = vmatmul.mubr.msk.f32.gmra.mrb[8].mxu1 %vm503_vm2, %v2171_v61 }
 0x103   : > { %2176 = vtanh.f32 %v413_v62  ;;  %1945 = vmatprep.mubr.msk.f32.mxu1 %vm2323_vm0, %v2322_v1 }
 0x104   : > { %v417_v0 = vpop.f32.mrb[16].mxu0 }
 0x105   : > { %v2173_v2 = vpop.eup %2172  ;;  %v418_v3 = vadd.f32 %v2551_v34, %v417_v0  ;;  %v1883_v5 = vpop.f32.mrb[17].mxu0 }
 0x106   : > { %1946 = vmatmul.mubr.msk.f32.gmra.mrb[10].mxu1 %vm503_vm2, %v2173_v2 }
 0x107   : > { %2178 = vtanh.f32 %v418_v3  ;;  %1948 = vmatprep.mubr.msk.f32.mxu1 %vm2323_vm0, %v2322_v1 }
 0x108   : > { %v422_v25 = vpop.f32.mrb[18].mxu0 }
 0x109   : > { %v2175_v26 = vpop.eup %2174  ;;  %v423_v27 = vadd.f32 %v2551_v34, %v422_v25  ;;  %v1886_v28 = vpop.f32.mrb[19].mxu0  ;;  %v2632_v25 = vld [vmem:[%s3068_s2 + $0x40] ss:$0 sm:$0xff] }
 0x10a   : > { %1949 = vmatmul.mubr.msk.f32.gmra.mrb[12].mxu1 %vm503_vm2, %v2175_v26 }
 0x10b   : > { %2180 = vtanh.f32 %v423_v27  ;;  %1951 = vmatprep.mubr.msk.f32.mxu1 %vm2323_vm0, %v2322_v1 }
 0x10c   : > { %v427_v29 = vpop.f32.mrb[20].mxu0 }
 0x10d   : > { %v2177_v30 = vpop.eup %2176  ;;  %v428_v31 = vadd.f32 %v2551_v34, %v427_v29  ;;  %v1889_v32 = vpop.f32.mrb[21].mxu0  ;;  %v2325_v29 = vmov 8  }
 0x10e   : > { %1952 = vmatmul.mubr.msk.f32.gmra.mrb[14].mxu1 %vm503_vm2, %v2177_v30  ;;  %2160 = vset.pattern.permute.xlu0 %v2325_v29 }
 0x10f   : > { %2182 = vtanh.f32 %v428_v31  ;;  %1954 = vmatprep.mubr.msk.f32.mxu1 %vm2323_vm0, %v2322_v1  ;;  %2161 = vset.pattern.permute.xlu1 %v2325_v29 }
 0x110   : > { %v432_v33 = vpop.f32.mrb[22].mxu0 }
 0x111   : > { %v2179_v35 = vpop.eup %2178  ;;  %v433_v36 = vadd.f32 %v2551_v34, %v432_v33  ;;  %v1892_v37 = vpop.f32.mrb[23].mxu0 }
 0x112   : > { %1955 = vmatmul.mubr.msk.f32.gmra.mrb[16].mxu1 %vm503_vm2, %v2179_v35 }
 0x113   : > { %2184 = vtanh.f32 %v433_v36  ;;  %1957 = vmatprep.mubr.msk.f32.mxu1 %vm2323_vm0, %v2322_v1 }
 0x114   : > { %v437_v38 = vpop.f32.mrb[24].mxu0 }
 0x115   : > { %v2181_v39 = vpop.eup %2180  ;;  %v438_v40 = vadd.f32 %v2551_v34, %v437_v38  ;;  %v1895_v41 = vpop.f32.mrb[25].mxu0 }
 0x116   : > { %1958 = vmatmul.mubr.msk.f32.gmra.mrb[18].mxu1 %vm503_vm2, %v2181_v39 }
 0x117   : > { %2186 = vtanh.f32 %v438_v40  ;;  %1960 = vmatprep.mubr.msk.f32.mxu1 %vm2323_vm0, %v2322_v1 }
 0x118   : > { %v442_v42 = vpop.f32.mrb[26].mxu0 }
 0x119   : > { %v2183_v43 = vpop.eup %2182  ;;  %v443_v44 = vadd.f32 %v2551_v34, %v442_v42  ;;  %v1898_v45 = vpop.f32.mrb[27].mxu0 }
 0x11a   : > { %1961 = vmatmul.mubr.msk.f32.gmra.mrb[20].mxu1 %vm503_vm2, %v2183_v43 }
 0x11b   : > { %2188 = vtanh.f32 %v443_v44  ;;  %1963 = vmatprep.mubr.msk.f32.mxu1 %vm2323_vm0, %v2322_v1 }
 0x11c   : > { %v447_v46 = vpop.f32.mrb[28].mxu0 }
 0x11d   : > { %v2185_v47 = vpop.eup %2184  ;;  %v448_v48 = vadd.f32 %v2551_v34, %v447_v46  ;;  %v1901_v49 = vpop.f32.mrb[29].mxu0 }
 0x11e   : > { %1964 = vmatmul.mubr.msk.f32.gmra.mrb[22].mxu1 %vm503_vm2, %v2185_v47 }
 0x11f   : > { %2190 = vtanh.f32 %v448_v48  ;;  %1966 = vmatprep.mubr.msk.f32.mxu1 %vm2323_vm0, %v2322_v1 }
 0x120   : > { %v452_v50 = vpop.f32.mrb[30].mxu0 }
 0x121   : > { %v2187_v51 = vpop.eup %2186  ;;  %v453_v52 = vadd.f32 %v2551_v34, %v452_v50  ;;  %v1904_v53 = vpop.f32.mrb[31].mxu0 }
 0x122   : > { %1967 = vmatmul.mubr.msk.f32.gmra.mrb[24].mxu1 %vm503_vm2, %v2187_v51 }
 0x123   : > { %2192 = vtanh.f32 %v453_v52  ;;  %1969 = vmatprep.mubr.msk.f32.mxu1 %vm2323_vm0, %v2322_v1 }
 0x124   : > { %v457_v54 = vpop.f32.mrb[32].mxu0 }
 0x125   : > { %v2189_v55 = vpop.eup %2188  ;;  %v458_v56 = vadd.f32 %v2551_v34, %v457_v54  ;;  %v1907_v57 = vpop.f32.mrb[33].mxu0 }
 0x126   : > { %1970 = vmatmul.mubr.msk.f32.gmra.mrb[26].mxu1 %vm503_vm2, %v2189_v55 }
 0x127   : > { %2194 = vtanh.f32 %v458_v56  ;;  %1972 = vmatprep.mubr.msk.f32.mxu1 %vm2323_vm0, %v2322_v1 }
 0x128   : > { %v462_v58 = vpop.f32.mrb[34].mxu0 }
 0x129   : > { %v2191_v59 = vpop.eup %2190  ;;  %v463_v60 = vadd.f32 %v2551_v34, %v462_v58  ;;  %v1910_v61 = vpop.f32.mrb[35].mxu0 }
 0x12a   : > { %1973 = vmatmul.mubr.msk.f32.gmra.mrb[28].mxu1 %vm503_vm2, %v2191_v59 }
 0x12b   : > { %1975 = vmatprep.mubr.msk.f32.mxu1 %vm2323_vm0, %v2322_v1  ;;  %2196 = vtanh.f32 %v463_v60 }
 0x12c   : > { %v467_v62 = vpop.f32.mrb[36].mxu0 }
 0x12d   : > { %v2193_v63 = vpop.eup %2192  ;;  %v468_v0 = vadd.f32 %v2551_v34, %v467_v62  ;;  %v1913_v2 = vpop.f32.mrb[37].mxu0 }
 0x12e   : > { %1976 = vmatmul.mubr.msk.f32.gmra.mrb[30].mxu1 %vm503_vm2, %v2193_v63 }
 0x12f   : > { %1978 = vmatprep.mubr.msk.f32.mxu1 %vm2323_vm0, %v2322_v1  ;;  %2198 = vtanh.f32 %v468_v0 }
 0x131   : > { %v2195_v3 = vpop.eup %2194 }
 0x132   : > { %1979 = vmatmul.mubr.msk.f32.gmra.mrb[32].mxu1 %vm503_vm2, %v2195_v3 }
 0x133   : > { %1981 = vmatprep.mubr.msk.f32.mxu1 %vm2323_vm0, %v2322_v1 }
 0x135   : > { %v2197_v5 = vpop.eup %2196 }
 0x136   : > { %1982 = vmatmul.mubr.msk.f32.gmra.mrb[34].mxu1 %vm503_vm2, %v2197_v5 }
 0x137   : > { %1984 = vmatprep.mubr.msk.f32.mxu1 %vm2323_vm0, %v2322_v1 }
 0x139   : > { %v2199_v34 = vpop.eup %2198 }
 0x13a   : > { %1985 = vmatmul.mubr.msk.f32.gmra.mrb[36].mxu1 %vm503_vm2, %v2199_v34 }
 0x13b   : > { %2063 = vmatprep.mubr.msk.f32.mxu1 %vm2323_vm0, %v2322_v1 }
 0x1c5   : > { %v627_v26 = vpop.f32.mrb[0].mxu1 }
 0x1c6   : > { %v628_v27 = vadd.f32 %v2632_v25, %v627_v26  ;;  %v1932_v28 = vpop.f32.mrb[1].mxu1 }
 0x1c8   : > { %2200 = vtanh.f32 %v628_v27 }
 0x1c9   : > { %v632_v30 = vpop.f32.mrb[2].mxu1 }
 0x1ca   : > { %v633_v31 = vadd.f32 %v2632_v25, %v632_v30  ;;  %v1935_v32 = vpop.f32.mrb[3].mxu1 }
 0x1cc   : > { %2202 = vtanh.f32 %v633_v31 }
 0x1cd   : > { %v637_v33 = vpop.f32.mrb[4].mxu1 }
 0x1ce   : > { %v638_v35 = vadd.f32 %v2632_v25, %v637_v33  ;;  %v1938_v36 = vpop.f32.mrb[5].mxu1 }
 0x1d0   : > { %2204 = vtanh.f32 %v638_v35 }
 0x1d1   : > { %v642_v37 = vpop.f32.mrb[6].mxu1 }
 0x1d2   : > { %v2637_v38 = vpop.eup %2200  ;;  %v643_v39 = vadd.f32 %v2632_v25, %v642_v37  ;;  %v1941_v40 = vpop.f32.mrb[7].mxu1 }
 0x1d3   : > { %766 = vrot.lane.b32.xlu0 %v2637_v38, %s2326_s24 }
 0x1d4   : > { %2206 = vtanh.f32 %v643_v39 }
 0x1d5   : > { %v647_v41 = vpop.f32.mrb[8].mxu1 }
 0x1d6   : > { %v2642_v42 = vpop.eup %2202  ;;  %v648_v43 = vadd.f32 %v2632_v25, %v647_v41  ;;  %v1944_v44 = vpop.f32.mrb[9].mxu1 }
 0x1d7   : > { %768 = vrot.lane.b32.xlu0 %v2642_v42, %s2326_s24 }
 0x1d8   : > { %2208 = vtanh.f32 %v648_v43 }
 0x1d9   : > { %v652_v45 = vpop.f32.mrb[10].mxu1 }
 0x1da   : > { %v2647_v46 = vpop.eup %2204  ;;  %v653_v47 = vadd.f32 %v2632_v25, %v652_v45  ;;  %v1947_v48 = vpop.f32.mrb[11].mxu1 }
 0x1db   : > { %770 = vrot.lane.b32.xlu1 %v2647_v46, %s2326_s24 }
 0x1dc   : > { %2210 = vtanh.f32 %v653_v47 }
 0x1dd   : > { %v657_v49 = vpop.f32.mrb[12].mxu1 }
 0x1de   : > { %v2652_v50 = vpop.eup %2206  ;;  %v658_v51 = vadd.f32 %v2632_v25, %v657_v49  ;;  %v1950_v52 = vpop.f32.mrb[13].mxu1 }
 0x1df   : > { %772 = vrot.lane.b32.xlu1 %v2652_v50, %s2326_s24 }
 0x1e0   : > { %2212 = vtanh.f32 %v658_v51 }
 0x1e1   : > { %v662_v53 = vpop.f32.mrb[14].mxu1 }
 0x1e2   : > { %v2657_v54 = vpop.eup %2208  ;;  %v663_v55 = vadd.f32 %v2632_v25, %v662_v53  ;;  %v1953_v56 = vpop.f32.mrb[15].mxu1 }
 0x1e3   : > { %774 = vrot.lane.b32.xlu0 %v2657_v54, %s2326_s24  ;;  %v740_v56 = vld [vmem:[%s3069_s3] sm:$0xff] }
 0x1e4   : > { %2214 = vtanh.f32 %v663_v55 }
 0x1e5   : > { %v667_v57 = vpop.f32.mrb[16].mxu1 }
 0x1e6   : > { %v2662_v58 = vpop.eup %2210  ;;  %v668_v59 = vadd.f32 %v2632_v25, %v667_v57  ;;  %v1956_v60 = vpop.f32.mrb[17].mxu1  ;;  %v741_v57 = vld [vmem:[%s3069_s3 + $0x8] sm:$0xff] }
 0x1e7   : > { %776 = vrot.lane.b32.xlu1 %v2662_v58, %s2326_s24 }
 0x1e8   : > { %2216 = vtanh.f32 %v668_v59  ;;  %v742_v59 = vld [vmem:[%s3069_s3 + $0x10] sm:$0xff] }
 0x1e9   : > { %v672_v61 = vpop.f32.mrb[18].mxu1 }
 0x1ea   : > { %v2667_v62 = vpop.eup %2212  ;;  %v673_v63 = vadd.f32 %v2632_v25, %v672_v61  ;;  %v1959_v0 = vpop.f32.mrb[19].mxu1  ;;  %v2130_v61 = vpack.c.bf16 %v741_v57, %v740_v56 }
 0x1eb   : > { %778 = vrot.lane.b32.xlu0 %v2667_v62, %s2326_s24 }
 0x1ec   : > { %2218 = vtanh.f32 %v673_v63  ;;  %v743_v63 = vld [vmem:[%s3069_s3 + $0x18] sm:$0xff]  ;;  %2131 = vmatpush3.bf16.msra.mxu0 %v2130_v61 }
 0x1ed   : > { %v677_v2 = vpop.f32.mrb[20].mxu1  ;;  %2132 = vmatprep.subr.bf16.mxu0 %v2324_v4 }
 0x1ee   : > { %v2672_v3 = vpop.eup %2214  ;;  %v678_v5 = vadd.f32 %v2632_v25, %v677_v2  ;;  %v1962_v34 = vpop.f32.mrb[21].mxu1 }
 0x1ef   : > { %780 = vrot.lane.b32.xlu1 %v2672_v3, %s2326_s24 }
 0x1f0   : > { %2220 = vtanh.f32 %v678_v5  ;;  %v2133_v5 = vpack.c.bf16 %v743_v63, %v742_v59 }
 0x1f1   : > { %v682_v26 = vpop.f32.mrb[22].mxu1 }
 0x1f2   : > { %v2677_v27 = vpop.eup %2216  ;;  %v683_v28 = vadd.f32 %v2632_v25, %v682_v26  ;;  %v1965_v29 = vpop.f32.mrb[23].mxu1  ;;  %2134 = vmatpush3.bf16.msra.mxu0 %v2133_v5 }
 0x1f3   : > { %782 = vrot.lane.b32.xlu0 %v2677_v27, %s2326_s24  ;;  %2135 = vmatprep.subr.bf16.mxu0 %v2324_v4 }
 0x1f4   : > { %2222 = vtanh.f32 %v683_v28 }
 0x1f5   : > { %v687_v30 = vpop.f32.mrb[24].mxu1 }
 0x1f6   : > { %v2682_v31 = vpop.eup %2218  ;;  %v688_v32 = vadd.f32 %v2632_v25, %v687_v30  ;;  %v1968_v33 = vpop.f32.mrb[25].mxu1 }
 0x1f7   : > { %784 = vrot.lane.b32.xlu1 %v2682_v31, %s2326_s24 }
 0x1f8   : > { %2224 = vtanh.f32 %v688_v32 }
 0x1f9   : > { %v692_v35 = vpop.f32.mrb[26].mxu1 }
 0x1fa   : > { %v2687_v36 = vpop.eup %2220  ;;  %v693_v37 = vadd.f32 %v2632_v25, %v692_v35  ;;  %v1971_v39 = vpop.f32.mrb[27].mxu1 }
 0x1fb   : > { %786 = vrot.lane.b32.xlu0 %v2687_v36, %s2326_s24 }
 0x1fc   : > { %2226 = vtanh.f32 %v693_v37 }
 0x1fd   : > { %v697_v40 = vpop.f32.mrb[28].mxu1 }
 0x1fe   : > { %v2692_v41 = vpop.eup %2222  ;;  %v698_v43 = vadd.f32 %v2632_v25, %v697_v40  ;;  %v1974_v44 = vpop.f32.mrb[29].mxu1 }
 0x1ff   : > { %788 = vrot.lane.b32.xlu1 %v2692_v41, %s2326_s24 }
 0x200   : > { %2228 = vtanh.f32 %v698_v43 }
 0x201   : > { %v702_v45 = vpop.f32.mrb[30].mxu1 }
 0x202   : > { %v2697_v47 = vpop.eup %2224  ;;  %v703_v48 = vadd.f32 %v2632_v25, %v702_v45  ;;  %v1977_v49 = vpop.f32.mrb[31].mxu1 }
 0x203   : > { %790 = vrot.lane.b32.xlu0 %v2697_v47, %s2326_s24 }
 0x204   : > { %2230 = vtanh.f32 %v703_v48 }
 0x205   : > { %v707_v51 = vpop.f32.mrb[32].mxu1 }
 0x206   : > { %v2702_v52 = vpop.eup %2226  ;;  %v708_v53 = vadd.f32 %v2632_v25, %v707_v51  ;;  %v1980_v55 = vpop.f32.mrb[33].mxu1 }
 0x207   : > { %792 = vrot.lane.b32.xlu1 %v2702_v52, %s2326_s24 }
 0x208   : > { %2232 = vtanh.f32 %v708_v53 }
 0x209   : > { %v712_v60 = vpop.f32.mrb[34].mxu1 }
 0x20a   : > { %v2719_v0 = vpop.eup %2228  ;;  %v1983_v2 = vpop.f32.mrb[35].mxu1  ;;  %v713_v30 = vadd.f32 %v2632_v25, %v712_v60 }
 0x20b   : > { %794 = vrot.lane.b32.xlu0 %v2719_v0, %s2326_s24 }
 0x20c   : > { %2234 = vtanh.f32 %v713_v30 }
 0x20d   : > { %v717_v34 = vpop.f32.mrb[36].mxu1 }
 0x20e   : > { %v2724_v26 = vpop.eup %2230  ;;  %v1986_v28 = vpop.f32.mrb[37].mxu1  ;;  %v718_v32 = vadd.f32 %v2632_v25, %v717_v34 }
 0x20f   : > { %796 = vrot.lane.b32.xlu1 %v2724_v26, %s2326_s24 }
 0x210   : > { %2236 = vtanh.f32 %v718_v32 }
 0x212   : > { %v2729_v29 = vpop.eup %2232 }
 0x213   : > { %798 = vrot.lane.b32.xlu1 %v2729_v29, %s2326_s24 }
 0x216   : > { %v2736_v37 = vpop.eup %2234 }
 0x21a   : > { %v2741_v43 = vpop.eup %2236 }
 0x245   : > { %v767_v33 = vpop.permute.xlu0 %766 }
 0x246   : > { %v823_v35 = vadd.f32 %v767_v33, %v2395_v6 }
 0x248   : > { %844 = vperm.xlu0 %2160, %v823_v35  }
 0x249   : > { %v769_v39 = vpop.permute.xlu0 %768 }
 0x24a   : > { %v824_v40 = vadd.f32 %v769_v39, %v2402_v7 }
 0x24c   : > { %849 = vperm.xlu1 %2161, %v824_v40   ;;  %800 = vrot.lane.b32.xlu0 %v2736_v37, %s2326_s24 }
 0x24d   : > { %v771_v44 = vpop.permute.xlu1 %770 }
 0x24e   : > { %v825_v45 = vadd.f32 %v771_v44, %v2409_v8 }
 0x250   : > { %854 = vperm.xlu1 %2161, %v825_v45   ;;  %802 = vrot.lane.b32.xlu0 %v2741_v43, %s2326_s24 }
 0x251   : > { %v773_v6 = vpop.permute.xlu1 %772 }
 0x252   : > { %v826_v25 = vadd.f32 %v773_v6, %v2416_v9 }
 0x254   : > { %859 = vperm.xlu1 %2161, %v826_v25  }
 0x255   : > { %v775_v48 = vpop.permute.xlu0 %774 }
 0x256   : > { %v827_v7 = vadd.f32 %v775_v48, %v2423_v10 }
 0x258   : > { %864 = vperm.xlu0 %2160, %v827_v7  }
 0x259   : > { %v777_v49 = vpop.permute.xlu1 %776 }
 0x25a   : > { %v828_v51 = vadd.f32 %v777_v49, %v2430_v11 }
 0x25c   : > { %869 = vperm.xlu1 %2161, %v828_v51  }
 0x25d   : > { %v779_v53 = vpop.permute.xlu0 %778 }
 0x25e   : > { %v829_v55 = vadd.f32 %v779_v53, %v2437_v12 }
 0x260   : > { %874 = vperm.xlu0 %2160, %v829_v55  }
 0x261   : > { %v781_v8 = vpop.permute.xlu1 %780 }
 0x262   : > { %v830_v56 = vadd.f32 %v781_v8, %v2444_v13 }
 0x264   : > { %879 = vperm.xlu1 %2161, %v830_v56  }
 0x265   : > { %v783_v57 = vpop.permute.xlu0 %782 }
 0x266   : > { %v831_v9 = vadd.f32 %v783_v57, %v2451_v14 }
 0x268   : > { %884 = vperm.xlu0 %2160, %v831_v9  }
 0x269   : > { %v785_v59 = vpop.permute.xlu1 %784 }
 0x26a   : > { %v832_v10 = vadd.f32 %v785_v59, %v2458_v15 }
 0x26c   : > { %889 = vperm.xlu1 %2161, %v832_v10  }
 0x26d   : > { %v787_v60 = vpop.permute.xlu0 %786 }
 0x26e   : > { %v833_v11 = vadd.f32 %v787_v60, %v2465_v16 }
 0x270   : > { %894 = vperm.xlu0 %2160, %v833_v11  }
 0x271   : > { %v789_v61 = vpop.permute.xlu1 %788 }
 0x272   : > { %v834_v12 = vadd.f32 %v789_v61, %v2472_v17 }
 0x274   : > { %899 = vperm.xlu1 %2161, %v834_v12  }
 0x275   : > { %v791_v63 = vpop.permute.xlu0 %790 }
 0x276   : > { %v835_v13 = vadd.f32 %v791_v63, %v2479_v18  ;;  %v2763_v18 = vld [vmem:[%s3069_s3 + $0x20] ss:$0 sm:$0xff] }
 0x278   : > { %904 = vperm.xlu0 %2160, %v835_v13  }
 0x279   : > { %v793_v2 = vpop.permute.xlu1 %792 }
 0x27a   : > { %v836_v14 = vadd.f32 %v793_v2, %v2486_v19  ;;  %v2768_v19 = vld [vmem:[%s3069_s3 + $0x28] ss:$0 sm:$0xff] }
 0x27c   : > { %909 = vperm.xlu1 %2161, %v836_v14  }
 0x27d   : > { %v795_v5 = vpop.permute.xlu0 %794 }
 0x27e   : > { %v837_v15 = vadd.f32 %v795_v5, %v2493_v20 }
 0x280   : > { %914 = vperm.xlu0 %2160, %v837_v15  }
 0x281   : > { %v797_v34 = vpop.permute.xlu1 %796 }
 0x282   : > { %v838_v16 = vadd.f32 %v797_v34, %v2500_v21 }
 0x284   : > { %919 = vperm.xlu1 %2161, %v838_v16  }
 0x285   : > { %v799_v28 = vpop.permute.xlu1 %798 }
 0x286   : > { %v839_v17 = vadd.f32 %v799_v28, %v2507_v22 }
 0x288   : > { %924 = vperm.xlu0 %2160, %v839_v17  }
 0x2c7   : > { %v845_v20 = vpop.permute.xlu0 %844 }
 0x2c8   : > { %v941_v30 = vmul.f32 %v2763_v18, %v845_v20 }
 0x2ca   : > { %v964_v21 = vadd.f32 %v2768_v19, %v941_v30 }
 0x2cb   : > { %v850_v32 = vpop.permute.xlu1 %849  ;;  %v801_v33 = vpop.permute.xlu0 %800 }
 0x2cc   : > { %2238 = vtanh.f32 %v964_v21  ;;  %v942_v22 = vmul.f32 %v2763_v18, %v850_v32  ;;  %v840_v35 = vadd.f32 %v801_v33, %v2514_v23 }
 0x2ce   : > { %v965_v39 = vadd.f32 %v2768_v19, %v942_v22  ;;  %929 = vperm.xlu1 %2161, %v840_v35  }
 0x2cf   : > { %v855_v40 = vpop.permute.xlu1 %854  ;;  %v803_v44 = vpop.permute.xlu0 %802 }
 0x2d0   : > { %2240 = vtanh.f32 %v965_v39  ;;  %v943_v45 = vmul.f32 %v2763_v18, %v855_v40  ;;  %v841_v6 = vadd.f32 %v803_v44, %v2521_v24 }
 0x2d2   : > { %v966_v25 = vadd.f32 %v2768_v19, %v943_v45  ;;  %934 = vperm.xlu0 %2160, %v841_v6  }
 0x2d3   : > { %v860_v48 = vpop.permute.xlu1 %859 }
 0x2d4   : > { %2242 = vtanh.f32 %v966_v25  ;;  %v944_v7 = vmul.f32 %v2763_v18, %v860_v48 }
 0x2d6   : > { %v2239_v49 = vpop.eup %2238  ;;  %v967_v23 = vadd.f32 %v2768_v19, %v944_v7 }
 0x2d7   : > { %1996 = vmatmul.mubr.msk.f32.vlgmr.msra.gmra.mrb[38].mxu0 %vm1006_vm3, %v2239_v49  ;;  %v865_v51 = vpop.permute.xlu0 %864 }
 0x2d8   : > { %2244 = vtanh.f32 %v967_v23  ;;  %v945_v53 = vmul.f32 %v2763_v18, %v865_v51  ;;  %1998 = vmatprep.mubr.msk.f32.mxu0 %vm2323_vm0, %v2322_v1 }
 0x2da   : > { %v2241_v24 = vpop.eup %2240  ;;  %v968_v55 = vadd.f32 %v2768_v19, %v945_v53 }
 0x2db   : > { %1999 = vmatmul.mubr.msk.f32.gmra.mrb[40].mxu0 %vm1006_vm3, %v2241_v24  ;;  %v870_v8 = vpop.permute.xlu1 %869 }
 0x2dc   : > { %2246 = vtanh.f32 %v968_v55  ;;  %v946_v56 = vmul.f32 %v2763_v18, %v870_v8  ;;  %2001 = vmatprep.mubr.msk.f32.mxu0 %vm2323_vm0, %v2322_v1 }
 0x2de   : > { %v2243_v57 = vpop.eup %2242  ;;  %v969_v9 = vadd.f32 %v2768_v19, %v946_v56 }
 0x2df   : > { %2002 = vmatmul.mubr.msk.f32.gmra.mrb[42].mxu0 %vm1006_vm3, %v2243_v57  ;;  %v875_v59 = vpop.permute.xlu0 %874 }
 0x2e0   : > { %2248 = vtanh.f32 %v969_v9  ;;  %v947_v10 = vmul.f32 %v2763_v18, %v875_v59  ;;  %2004 = vmatprep.mubr.msk.f32.mxu0 %vm2323_vm0, %v2322_v1 }
 0x2e2   : > { %v2245_v60 = vpop.eup %2244  ;;  %v970_v11 = vadd.f32 %v2768_v19, %v947_v10 }
 0x2e3   : > { %2005 = vmatmul.mubr.msk.f32.gmra.mrb[44].mxu0 %vm1006_vm3, %v2245_v60  ;;  %v880_v61 = vpop.permute.xlu1 %879 }
 0x2e4   : > { %2250 = vtanh.f32 %v970_v11  ;;  %v948_v12 = vmul.f32 %v2763_v18, %v880_v61  ;;  %2007 = vmatprep.mubr.msk.f32.mxu0 %vm2323_vm0, %v2322_v1 }
 0x2e6   : > { %v2247_v63 = vpop.eup %2246  ;;  %v971_v13 = vadd.f32 %v2768_v19, %v948_v12 }
 0x2e7   : > { %2008 = vmatmul.mubr.msk.f32.gmra.mrb[46].mxu0 %vm1006_vm3, %v2247_v63  ;;  %v885_v2 = vpop.permute.xlu0 %884 }
 0x2e8   : > { %2252 = vtanh.f32 %v971_v13  ;;  %v949_v14 = vmul.f32 %v2763_v18, %v885_v2  ;;  %2010 = vmatprep.mubr.msk.f32.mxu0 %vm2323_vm0, %v2322_v1 }
 0x2ea   : > { %v2249_v5 = vpop.eup %2248  ;;  %v972_v15 = vadd.f32 %v2768_v19, %v949_v14 }
 0x2eb   : > { %v890_v34 = vpop.permute.xlu1 %889  ;;  %2011 = vmatmul.mubr.msk.f32.gmra.mrb[48].mxu0 %vm1006_vm3, %v2249_v5 }
 0x2ec   : > { %2254 = vtanh.f32 %v972_v15  ;;  %v950_v16 = vmul.f32 %v2763_v18, %v890_v34  ;;  %2013 = vmatprep.mubr.msk.f32.mxu0 %vm2323_vm0, %v2322_v1 }
 0x2ee   : > { %v2251_v28 = vpop.eup %2250  ;;  %v973_v17 = vadd.f32 %v2768_v19, %v950_v16 }
 0x2ef   : > { %2014 = vmatmul.mubr.msk.f32.gmra.mrb[50].mxu0 %vm1006_vm3, %v2251_v28  ;;  %v895_v20 = vpop.permute.xlu0 %894 }
 0x2f0   : > { %2256 = vtanh.f32 %v973_v17  ;;  %v951_v30 = vmul.f32 %v2763_v18, %v895_v20  ;;  %2016 = vmatprep.mubr.msk.f32.mxu0 %vm2323_vm0, %v2322_v1 }
 0x2f2   : > { %v2253_v21 = vpop.eup %2252  ;;  %v974_v32 = vadd.f32 %v2768_v19, %v951_v30 }
 0x2f3   : > { %v900_v33 = vpop.permute.xlu1 %899  ;;  %2017 = vmatmul.mubr.msk.f32.gmra.mrb[52].mxu0 %vm1006_vm3, %v2253_v21 }
 0x2f4   : > { %2258 = vtanh.f32 %v974_v32  ;;  %v952_v22 = vmul.f32 %v2763_v18, %v900_v33  ;;  %2019 = vmatprep.mubr.msk.f32.mxu0 %vm2323_vm0, %v2322_v1 }
 0x2f6   : > { %v2255_v35 = vpop.eup %2254  ;;  %v975_v39 = vadd.f32 %v2768_v19, %v952_v22 }
 0x2f7   : > { %2020 = vmatmul.mubr.msk.f32.gmra.mrb[54].mxu0 %vm1006_vm3, %v2255_v35  ;;  %v905_v40 = vpop.permute.xlu0 %904 }
 0x2f8   : > { %2260 = vtanh.f32 %v975_v39  ;;  %v953_v44 = vmul.f32 %v2763_v18, %v905_v40  ;;  %2022 = vmatprep.mubr.msk.f32.mxu0 %vm2323_vm0, %v2322_v1 }
 0x2fa   : > { %v2257_v45 = vpop.eup %2256  ;;  %v976_v6 = vadd.f32 %v2768_v19, %v953_v44 }
 0x2fb   : > { %v910_v25 = vpop.permute.xlu1 %909  ;;  %2023 = vmatmul.mubr.msk.f32.gmra.mrb[56].mxu0 %vm1006_vm3, %v2257_v45 }
 0x2fc   : > { %2262 = vtanh.f32 %v976_v6  ;;  %v954_v48 = vmul.f32 %v2763_v18, %v910_v25  ;;  %2025 = vmatprep.mubr.msk.f32.mxu0 %vm2323_vm0, %v2322_v1 }
 0x2fe   : > { %v2259_v7 = vpop.eup %2258  ;;  %v977_v49 = vadd.f32 %v2768_v19, %v954_v48 }
 0x2ff   : > { %2026 = vmatmul.mubr.msk.f32.gmra.mrb[58].mxu0 %vm1006_vm3, %v2259_v7  ;;  %v915_v23 = vpop.permute.xlu0 %914 }
 0x300   : > { %2264 = vtanh.f32 %v977_v49  ;;  %v955_v51 = vmul.f32 %v2763_v18, %v915_v23  ;;  %2028 = vmatprep.mubr.msk.f32.mxu0 %vm2323_vm0, %v2322_v1 }
 0x302   : > { %v2261_v53 = vpop.eup %2260  ;;  %v978_v24 = vadd.f32 %v2768_v19, %v955_v51 }
 0x303   : > { %v920_v55 = vpop.permute.xlu1 %919  ;;  %2029 = vmatmul.mubr.msk.f32.gmra.mrb[60].mxu0 %vm1006_vm3, %v2261_v53 }
 0x304   : > { %2266 = vtanh.f32 %v978_v24  ;;  %v956_v8 = vmul.f32 %v2763_v18, %v920_v55  ;;  %2031 = vmatprep.mubr.msk.f32.mxu0 %vm2323_vm0, %v2322_v1 }
 0x306   : > { %v2263_v56 = vpop.eup %2262  ;;  %v979_v57 = vadd.f32 %v2768_v19, %v956_v8 }
 0x307   : > { %2032 = vmatmul.mubr.msk.f32.gmra.mrb[62].mxu0 %vm1006_vm3, %v2263_v56  ;;  %v925_v9 = vpop.permute.xlu0 %924 }
 0x308   : > { %2268 = vtanh.f32 %v979_v57  ;;  %v957_v59 = vmul.f32 %v2763_v18, %v925_v9  ;;  %2034 = vmatprep.mubr.msk.f32.mxu0 %vm2323_vm0, %v2322_v1 }
 0x30a   : > { %v2265_v10 = vpop.eup %2264  ;;  %v980_v60 = vadd.f32 %v2768_v19, %v957_v59 }
 0x30b   : > { %2035 = vmatmul.mubr.msk.f32.gmra.mrb[64].mxu0 %vm1006_vm3, %v2265_v10 }
 0x30c   : > { %2270 = vtanh.f32 %v980_v60  ;;  %2037 = vmatprep.mubr.msk.f32.mxu0 %vm2323_vm0, %v2322_v1 }
 0x30e   : > { %v2267_v11 = vpop.eup %2266 }
 0x30f   : > { %2038 = vmatmul.mubr.msk.f32.gmra.mrb[66].mxu0 %vm1006_vm3, %v2267_v11 }
 0x310   : > { %2040 = vmatprep.mubr.msk.f32.mxu0 %vm2323_vm0, %v2322_v1 }
 0x312   : > { %v2269_v61 = vpop.eup %2268 }
 0x313   : > { %2041 = vmatmul.mubr.msk.f32.gmra.mrb[68].mxu0 %vm1006_vm3, %v2269_v61 }
 0x314   : > { %2043 = vmatprep.mubr.msk.f32.mxu0 %vm2323_vm0, %v2322_v1 }
 0x316   : > { %v2271_v12 = vpop.eup %2270 }
 0x317   : > { %2044 = vmatmul.mubr.msk.f32.gmra.mrb[70].mxu0 %vm1006_vm3, %v2271_v12 }
 0x318   : > { %2046 = vmatprep.mubr.msk.f32.mxu0 %vm2323_vm0, %v2322_v1 }
 0x34d   : > { %v930_v63 = vpop.permute.xlu1 %929 }
 0x34e   : > { %v958_v13 = vmul.f32 %v2763_v18, %v930_v63 }
 0x350   : > { %v981_v2 = vadd.f32 %v2768_v19, %v958_v13 }
 0x351   : > { %v935_v14 = vpop.permute.xlu0 %934 }
 0x352   : > { %2272 = vtanh.f32 %v981_v2  ;;  %v959_v5 = vmul.f32 %v2763_v18, %v935_v14  ;;  %v2872_v18 = vld [vmem:[%s3069_s3 + $0x30] ss:$0 sm:$0xff] }
 0x354   : > { %v982_v15 = vadd.f32 %v2768_v19, %v959_v5 }
 0x356   : > { %2274 = vtanh.f32 %v982_v15 }
 0x35c   : > { %v2273_v34 = vpop.eup %2272 }
 0x35d   : > { %2047 = vmatmul.mubr.msk.f32.gmra.mrb[72].mxu0 %vm1006_vm3, %v2273_v34 }
 0x35e   : > { %2049 = vmatprep.mubr.msk.f32.mxu0 %vm2323_vm0, %v2322_v1 }
 0x360   : > { %v2275_v16 = vpop.eup %2274 }
 0x361   : > { %2050 = vmatmul.mubr.msk.f32.gmra.mrb[74].mxu0 %vm1006_vm3, %v2275_v16 }
 0x362   : > { %2060 = vmatprep.mubr.msk.f32.mxu0 %vm2323_vm0, %v2322_v1 }
 0x3aa   : > { %v2867_v28 = vpop.f32.mrb[38].mxu0 }
 0x3ab   : > { %v1997_v17 = vpop.f32.mrb[39].mxu0 }
 0x3ae   : > { %v1135_v19 = vpop.f32.mrb[40].mxu0 }
 0x3af   : > { %v1136_v20 = vadd.f32 %v2872_v18, %v1135_v19  ;;  %v2000_v30 = vpop.f32.mrb[41].mxu0 }
 0x3b1   : > { %2276 = vtanh.f32 %v1136_v20 }
 0x3b2   : > { %v1140_v21 = vpop.f32.mrb[42].mxu0 }
 0x3b3   : > { %v1141_v32 = vadd.f32 %v2872_v18, %v1140_v21  ;;  %v2003_v33 = vpop.f32.mrb[43].mxu0 }
 0x3b5   : > { %2278 = vtanh.f32 %v1141_v32 }
 0x3b6   : > { %v1145_v22 = vpop.f32.mrb[44].mxu0 }
 0x3b7   : > { %v1146_v35 = vadd.f32 %v2872_v18, %v1145_v22  ;;  %v2006_v39 = vpop.f32.mrb[45].mxu0 }
 0x3b9   : > { %2280 = vtanh.f32 %v1146_v35 }
 0x3ba   : > { %v1150_v40 = vpop.f32.mrb[46].mxu0 }
 0x3bb   : > { %v2277_v44 = vpop.eup %2276  ;;  %v1151_v45 = vadd.f32 %v2872_v18, %v1150_v40  ;;  %v2009_v6 = vpop.f32.mrb[47].mxu0 }
 0x3bc   : > { %1264 = vrot.lane.b32.xlu1 %v2277_v44, %s2327_s15  ;;  %v1131_v6 = vadd.f32 %v2872_v18, %v2867_v28 }
 0x3bd   : > { %2282 = vtanh.f32 %v1151_v45 }
 0x3be   : > { %v1155_v25 = vpop.f32.mrb[48].mxu0 }
 0x3bf   : > { %v2279_v48 = vpop.eup %2278  ;;  %v1156_v7 = vadd.f32 %v2872_v18, %v1155_v25  ;;  %v2012_v49 = vpop.f32.mrb[49].mxu0 }
 0x3c0   : > { %1266 = vrot.lane.b32.xlu0 %v2279_v48, %s2327_s15 }
 0x3c1   : > { %2284 = vtanh.f32 %v1156_v7 }
 0x3c2   : > { %v1160_v23 = vpop.f32.mrb[50].mxu0 }
 0x3c3   : > { %v2281_v51 = vpop.eup %2280  ;;  %v1161_v53 = vadd.f32 %v2872_v18, %v1160_v23  ;;  %v2015_v24 = vpop.f32.mrb[51].mxu0 }
 0x3c4   : > { %1268 = vrot.lane.b32.xlu1 %v2281_v51, %s2327_s15 }
 0x3c5   : > { %2286 = vtanh.f32 %v1161_v53 }
 0x3c6   : > { %v1165_v55 = vpop.f32.mrb[52].mxu0 }
 0x3c7   : > { %v2283_v8 = vpop.eup %2282  ;;  %v1166_v56 = vadd.f32 %v2872_v18, %v1165_v55  ;;  %v2018_v57 = vpop.f32.mrb[53].mxu0  ;;  %v1338_v55 = vld [vmem:[%s3070_s4] sm:$0xff] }
 0x3c8   : > { %1270 = vrot.lane.b32.xlu0 %v2283_v8, %s2327_s15  ;;  %v1339_v8 = vld [vmem:[%s3070_s4 + $0x8] sm:$0xff] }
 0x3c9   : > { %2288 = vtanh.f32 %v1166_v56  ;;  %v2136_v57 = vpack.c.bf16 %v1339_v8, %v1338_v55 }
 0x3ca   : > { %v1170_v9 = vpop.f32.mrb[54].mxu0 }
 0x3cb   : > { %v2285_v59 = vpop.eup %2284  ;;  %v1171_v10 = vadd.f32 %v2872_v18, %v1170_v9  ;;  %v2021_v60 = vpop.f32.mrb[55].mxu0  ;;  %v1340_v9 = vld [vmem:[%s3070_s4 + $0x10] sm:$0xff]  ;;  %2143 = vmatpush3.bf16.msra.mxu1 %v2136_v57  ;;  %2137 = vmatpush3.bf16.msra.mxu0 %v2136_v57 }
 0x3cc   : > { %1272 = vrot.lane.b32.xlu1 %v2285_v59, %s2327_s15  ;;  %v1341_v59 = vld [vmem:[%s3070_s4 + $0x18] sm:$0xff]  ;;  %2142 = vmatprep.subr.bf16.mxu1 %v2324_v4 }
 0x3cd   : > { %2290 = vtanh.f32 %v1171_v10  ;;  %v2139_v60 = vpack.c.bf16 %v1341_v59, %v1340_v9  ;;  %2138 = vmatprep.subr.bf16.mxu0 %v2324_v4 }
 0x3ce   : > { %v1175_v11 = vpop.f32.mrb[56].mxu0 }
 0x3cf   : > { %v2287_v61 = vpop.eup %2286  ;;  %v1176_v12 = vadd.f32 %v2872_v18, %v1175_v11  ;;  %v2024_v63 = vpop.f32.mrb[57].mxu0  ;;  %2144 = vmatpush3.bf16.msra.mxu1 %v2139_v60  ;;  %2140 = vmatpush3.bf16.msra.mxu0 %v2139_v60 }
 0x3d0   : > { %1274 = vrot.lane.b32.xlu0 %v2287_v61, %s2327_s15 }
 0x3d1   : > { %2292 = vtanh.f32 %v1176_v12 }
 0x3d2   : > { %v1180_v13 = vpop.f32.mrb[58].mxu0 }
 0x3d3   : > { %v2289_v2 = vpop.eup %2288  ;;  %v1181_v14 = vadd.f32 %v2872_v18, %v1180_v13  ;;  %v2027_v5 = vpop.f32.mrb[59].mxu0 }
 0x3d4   : > { %1276 = vrot.lane.b32.xlu1 %v2289_v2, %s2327_s15 }
 0x3d5   : > { %2294 = vtanh.f32 %v1181_v14 }
 0x3d6   : > { %v1185_v15 = vpop.f32.mrb[60].mxu0 }
 0x3d7   : > { %v2291_v34 = vpop.eup %2290  ;;  %v1186_v16 = vadd.f32 %v2872_v18, %v1185_v15  ;;  %v2030_v17 = vpop.f32.mrb[61].mxu0 }
 0x3d8   : > { %1278 = vrot.lane.b32.xlu0 %v2291_v34, %s2327_s15 }
 0x3d9   : > { %2296 = vtanh.f32 %v1186_v16 }
 0x3da   : > { %v1190_v19 = vpop.f32.mrb[62].mxu0 }
 0x3db   : > { %v2293_v20 = vpop.eup %2292  ;;  %v1191_v30 = vadd.f32 %v2872_v18, %v1190_v19  ;;  %v2033_v21 = vpop.f32.mrb[63].mxu0 }
 0x3dc   : > { %1280 = vrot.lane.b32.xlu1 %v2293_v20, %s2327_s15 }
 0x3dd   : > { %2298 = vtanh.f32 %v1191_v30 }
 0x3de   : > { %v1195_v32 = vpop.f32.mrb[64].mxu0 }
 0x3df   : > { %v2295_v33 = vpop.eup %2294  ;;  %v1196_v22 = vadd.f32 %v2872_v18, %v1195_v32  ;;  %v2036_v35 = vpop.f32.mrb[65].mxu0 }
 0x3e0   : > { %1282 = vrot.lane.b32.xlu0 %v2295_v33, %s2327_s15 }
 0x3e1   : > { %2300 = vtanh.f32 %v1196_v22 }
 0x3e2   : > { %v1200_v39 = vpop.f32.mrb[66].mxu0 }
 0x3e3   : > { %v2297_v40 = vpop.eup %2296  ;;  %v1201_v44 = vadd.f32 %v2872_v18, %v1200_v39  ;;  %v2039_v45 = vpop.f32.mrb[67].mxu0 }
 0x3e4   : > { %1284 = vrot.lane.b32.xlu1 %v2297_v40, %s2327_s15 }
 0x3e5   : > { %2302 = vtanh.f32 %v1201_v44 }
 0x3e6   : > { %v1205_v25 = vpop.f32.mrb[68].mxu0  ;;  %2304 = vtanh.f32 %v1131_v6 }
 0x3e7   : > { %v2299_v48 = vpop.eup %2298  ;;  %v1206_v7 = vadd.f32 %v2872_v18, %v1205_v25  ;;  %v2042_v49 = vpop.f32.mrb[69].mxu0 }
 0x3e8   : > { %1286 = vrot.lane.b32.xlu0 %v2299_v48, %s2327_s15 }
 0x3e9   : > { %2306 = vtanh.f32 %v1206_v7 }
 0x3ea   : > { %v1210_v23 = vpop.f32.mrb[70].mxu0 }
 0x3eb   : > { %v2301_v51 = vpop.eup %2300  ;;  %v1211_v53 = vadd.f32 %v2872_v18, %v1210_v23  ;;  %v2045_v24 = vpop.f32.mrb[71].mxu0 }
 0x3ec   : > { %1288 = vrot.lane.b32.xlu1 %v2301_v51, %s2327_s15 }
 0x3ed   : > { %2308 = vtanh.f32 %v1211_v53 }
 0x3ef   : > { %v2303_v28 = vpop.eup %2302 }
 0x3f0   : > { %1290 = vrot.lane.b32.xlu0 %v2303_v28, %s2327_s15  ;;  %v2305_v56 = vpop.eup %2304 }
 0x3f3   : > { %v2307_v10 = vpop.eup %2306 }
 0x3f4   : > { %1262 = vrot.lane.b32.xlu0 %v2305_v56, %s2327_s15  ;;  %1292 = vrot.lane.b32.xlu1 %v2307_v10, %s2327_s15 }
 0x3f7   : > { %v2309_v11 = vpop.eup %2308 }
 0x3f8   : > { %1294 = vrot.lane.b32.xlu0 %v2309_v11, %s2327_s15 }
 0x42e   : > { %v1265_v61 = vpop.permute.xlu1 %1264 }
 0x42f   : > { %v1320_v12 = vmul.f32 %v2642_v42, %v1265_v61 }
 0x430   : > { %v1215_v63 = vpop.f32.mrb[72].mxu0 }
 0x431   : > { %v1216_v13 = vadd.f32 %v2872_v18, %v1215_v63  ;;  %1363 = vrot.lane.b32.xlu1 %v1320_v12, %s2328_s26  ;;  %v2048_v2 = vpop.f32.mrb[73].mxu0 }
 0x432   : > { %v1267_v14 = vpop.permute.xlu0 %1266 }
 0x433   : > { %2310 = vtanh.f32 %v1216_v13  ;;  %v1321_v5 = vmul.f32 %v2647_v46, %v1267_v14 }
 0x434   : > { %v1220_v4 = vpop.f32.mrb[74].mxu0 }
 0x435   : > { %v1221_v15 = vadd.f32 %v2872_v18, %v1220_v4  ;;  %1365 = vrot.lane.b32.xlu1 %v1321_v5, %s2328_s26  ;;  %v2051_v34 = vpop.f32.mrb[75].mxu0 }
 0x436   : > { %v1269_v42 = vpop.permute.xlu1 %1268 }
 0x437   : > { %2312 = vtanh.f32 %v1221_v15  ;;  %v1322_v17 = vmul.f32 %v2652_v50, %v1269_v42 }
 0x43a   : > { %v1271_v20 = vpop.permute.xlu0 %1270 }
 0x43b   : > { %v1323_v46 = vmul.f32 %v2657_v54, %v1271_v20 }
 0x43d   : > { %v2311_v16 = vpop.eup %2310 }
 0x43e   : > { %1296 = vrot.lane.b32.xlu0 %v2311_v16, %s2327_s15  ;;  %v1273_v30 = vpop.permute.xlu1 %1272 }
 0x43f   : > { %v1324_v18 = vmul.f32 %v2662_v58, %v1273_v30 }
 0x441   : > { %v2313_v19 = vpop.eup %2312 }
 0x442   : > { %1367 = vrot.lane.b32.xlu0 %v1322_v17, %s2328_s26  ;;  %1298 = vrot.lane.b32.xlu1 %v2313_v19, %s2327_s15  ;;  %v1275_v21 = vpop.permute.xlu0 %1274 }
 0x443   : > { %v1325_v50 = vmul.f32 %v2667_v62, %v1275_v21 }
 0x446   : > { %v1277_v32 = vpop.permute.xlu1 %1276  ;;  %1371 = vrot.lane.b32.xlu0 %v1324_v18, %s2328_s26  ;;  %1369 = vrot.lane.b32.xlu1 %v1323_v46, %s2328_s26 }
 0x447   : > { %v1326_v33 = vmul.f32 %v2672_v3, %v1277_v32 }
 0x44a   : > { %v1279_v22 = vpop.permute.xlu0 %1278  ;;  %1375 = vrot.lane.b32.xlu0 %v1326_v33, %s2328_s26  ;;  %1373 = vrot.lane.b32.xlu1 %v1325_v50, %s2328_s26 }
 0x44b   : > { %v1327_v35 = vmul.f32 %v2677_v27, %v1279_v22 }
 0x44e   : > { %v1281_v54 = vpop.permute.xlu1 %1280  ;;  %1377 = vrot.lane.b32.xlu1 %v1327_v35, %s2328_s26 }
 0x44f   : > { %v1328_v58 = vmul.f32 %v2682_v31, %v1281_v54 }
 0x451   : > { %1379 = vrot.lane.b32.xlu0 %v1328_v58, %s2328_s26 }
 0x452   : > { %v1283_v39 = vpop.permute.xlu0 %1282 }
 0x453   : > { %v1329_v40 = vmul.f32 %v2687_v36, %v1283_v39 }
 0x455   : > { %1381 = vrot.lane.b32.xlu1 %v1329_v40, %s2328_s26 }
 0x456   : > { %v1285_v62 = vpop.permute.xlu1 %1284 }
 0x457   : > { %v1330_v3 = vmul.f32 %v2692_v41, %v1285_v62 }
 0x459   : > { %1383 = vrot.lane.b32.xlu0 %v1330_v3, %s2328_s26 }
 0x45a   : > { %v1287_v44 = vpop.permute.xlu0 %1286 }
 0x45b   : > { %v1331_v27 = vmul.f32 %v2697_v47, %v1287_v44 }
 0x45d   : > { %1385 = vrot.lane.b32.xlu1 %v1331_v27, %s2328_s26 }
 0x45e   : > { %v1289_v45 = vpop.permute.xlu1 %1288 }
 0x45f   : > { %v1332_v31 = vmul.f32 %v2702_v52, %v1289_v45 }
 0x461   : > { %1387 = vrot.lane.b32.xlu0 %v1332_v31, %s2328_s26 }
 0x462   : > { %v1291_v6 = vpop.permute.xlu0 %1290 }
 0x463   : > { %v1333_v36 = vmul.f32 %v2719_v0, %v1291_v6 }
 0x465   : > { %1389 = vrot.lane.b32.xlu1 %v1333_v36, %s2328_s26 }
 0x466   : > { %v1263_v25 = vpop.permute.xlu0 %1262  ;;  %v1293_v48 = vpop.permute.xlu1 %1292 }
 0x467   : > { %v1334_v41 = vmul.f32 %v2724_v26, %v1293_v48  ;;  %v1319_v52 = vmul.f32 %v2637_v38, %v1263_v25 }
 0x469   : > { %1391 = vrot.lane.b32.xlu0 %v1334_v41, %s2328_s26 }
 0x46a   : > { %v1295_v7 = vpop.permute.xlu0 %1294 }
 0x46b   : > { %v1335_v47 = vmul.f32 %v2729_v29, %v1295_v7 }
 0x46d   : > { %1393 = vrot.lane.b32.xlu1 %v1335_v47, %s2328_s26 }
 0x471   : > { %1361 = vrot.lane.b32.xlu1 %v1319_v52, %s2328_s26 }
 0x4a3   : > { %v1364_v49 = vpop.permute.xlu1 %1363 }
 0x4a4   : > { %2064 = vmatmul.mubr.msk.f32.vlgmr.msra.gmra.mrb[38].mxu1 %vm1006_vm3, %v1364_v49 }
 0x4a5   : > { %2066 = vmatprep.mubr.msk.f32.mxu1 %vm2323_vm0, %v2322_v1 }
 0x4a7   : > { %v1366_v0 = vpop.permute.xlu1 %1365 }
 0x4a8   : > { %2067 = vmatmul.mubr.msk.f32.gmra.mrb[40].mxu1 %vm1006_vm3, %v1366_v0 }
 0x4a9   : > { %2069 = vmatprep.mubr.msk.f32.mxu1 %vm2323_vm0, %v2322_v1 }
 0x4b0   : > { %v1297_v26 = vpop.permute.xlu0 %1296 }
 0x4b1   : > { %v1336_v29 = vmul.f32 %v2736_v37, %v1297_v26 }
 0x4b3   : > { %1395 = vrot.lane.b32.xlu0 %v1336_v29, %s2328_s26 }
 0x4b4   : > { %v1368_v38 = vpop.permute.xlu0 %1367  ;;  %v1299_v23 = vpop.permute.xlu1 %1298 }
 0x4b5   : > { %v1337_v51 = vmul.f32 %v2741_v43, %v1299_v23  ;;  %2070 = vmatmul.mubr.msk.f32.gmra.mrb[42].mxu1 %vm1006_vm3, %v1368_v38 }
 0x4b6   : > { %2072 = vmatprep.mubr.msk.f32.mxu1 %vm2323_vm0, %v2322_v1 }
 0x4b7   : > { %1397 = vrot.lane.b32.xlu0 %v1337_v51, %s2328_s26 }
 0x4b8   : > { %v1370_v53 = vpop.permute.xlu1 %1369  ;;  %v1372_v37 = vpop.permute.xlu0 %1371 }
 0x4b9   : > { %2073 = vmatmul.mubr.msk.f32.gmra.mrb[44].mxu1 %vm1006_vm3, %v1370_v53 }
 0x4ba   : > { %2075 = vmatprep.mubr.msk.f32.mxu1 %vm2323_vm0, %v2322_v1 }
 0x4bc   : > { %v1374_v43 = vpop.permute.xlu1 %1373  ;;  %v1376_v24 = vpop.permute.xlu0 %1375 }
 0x4bd   : > { %2076 = vmatmul.mubr.msk.f32.gmra.mrb[46].mxu1 %vm1006_vm3, %v1372_v37 }
 0x4be   : > { %2078 = vmatprep.mubr.msk.f32.mxu1 %vm2323_vm0, %v2322_v1 }
 0x4c0   : > { %v1378_v28 = vpop.permute.xlu1 %1377 }
 0x4c1   : > { %2079 = vmatmul.mubr.msk.f32.gmra.mrb[48].mxu1 %vm1006_vm3, %v1374_v43 }
 0x4c2   : > { %2081 = vmatprep.mubr.msk.f32.mxu1 %vm2323_vm0, %v2322_v1 }
 0x4c3   : > { %v1380_v55 = vpop.permute.xlu0 %1379 }
 0x4c5   : > { %2082 = vmatmul.mubr.msk.f32.gmra.mrb[50].mxu1 %vm1006_vm3, %v1376_v24 }
 0x4c6   : > { %2084 = vmatprep.mubr.msk.f32.mxu1 %vm2323_vm0, %v2322_v1 }
 0x4c7   : > { %v1382_v8 = vpop.permute.xlu1 %1381 }
 0x4c9   : > { %2085 = vmatmul.mubr.msk.f32.gmra.mrb[52].mxu1 %vm1006_vm3, %v1378_v28 }
 0x4ca   : > { %2087 = vmatprep.mubr.msk.f32.mxu1 %vm2323_vm0, %v2322_v1 }
 0x4cb   : > { %v1384_v56 = vpop.permute.xlu0 %1383 }
 0x4cd   : > { %2088 = vmatmul.mubr.msk.f32.gmra.mrb[54].mxu1 %vm1006_vm3, %v1380_v55 }
 0x4ce   : > { %2090 = vmatprep.mubr.msk.f32.mxu1 %vm2323_vm0, %v2322_v1 }
 0x4cf   : > { %v1386_v57 = vpop.permute.xlu1 %1385 }
 0x4d1   : > { %2091 = vmatmul.mubr.msk.f32.gmra.mrb[56].mxu1 %vm1006_vm3, %v1382_v8 }
 0x4d2   : > { %2093 = vmatprep.mubr.msk.f32.mxu1 %vm2323_vm0, %v2322_v1 }
 0x4d3   : > { %v1388_v59 = vpop.permute.xlu0 %1387 }
 0x4d5   : > { %2094 = vmatmul.mubr.msk.f32.gmra.mrb[58].mxu1 %vm1006_vm3, %v1384_v56 }
 0x4d6   : > { %2096 = vmatprep.mubr.msk.f32.mxu1 %vm2323_vm0, %v2322_v1 }
 0x4d7   : > { %v1390_v9 = vpop.permute.xlu1 %1389 }
 0x4d9   : > { %2097 = vmatmul.mubr.msk.f32.gmra.mrb[60].mxu1 %vm1006_vm3, %v1386_v57 }
 0x4da   : > { %2099 = vmatprep.mubr.msk.f32.mxu1 %vm2323_vm0, %v2322_v1 }
 0x4db   : > { %v1392_v11 = vpop.permute.xlu0 %1391 }
 0x4dd   : > { %2100 = vmatmul.mubr.msk.f32.gmra.mrb[62].mxu1 %vm1006_vm3, %v1388_v59 }
 0x4de   : > { %2102 = vmatprep.mubr.msk.f32.mxu1 %vm2323_vm0, %v2322_v1 }
 0x4df   : > { %v1394_v10 = vpop.permute.xlu1 %1393 }
 0x4e1   : > { %2103 = vmatmul.mubr.msk.f32.gmra.mrb[64].mxu1 %vm1006_vm3, %v1390_v9 }
 0x4e2   : > { %2105 = vmatprep.mubr.msk.f32.mxu1 %vm2323_vm0, %v2322_v1 }
 0x4e3   : > { %v1362_v60 = vpop.permute.xlu1 %1361 }
 0x4e4   : > { %2061 = vmatmul.mubr.msk.f32.vlgmr.msra.gmra.mrb[76].mxu0 %vm1006_vm3, %v1362_v60 }
 0x4e5   : > { %2106 = vmatmul.mubr.msk.f32.gmra.mrb[66].mxu1 %vm1006_vm3, %v1392_v11 }
 0x4e6   : > { %2108 = vmatprep.mubr.msk.f32.mxu1 %vm2323_vm0, %v2322_v1 }
 0x4e9   : > { %2109 = vmatmul.mubr.msk.f32.gmra.mrb[68].mxu1 %vm1006_vm3, %v1394_v10 }
 0x4ea   : > { %2111 = vmatprep.mubr.msk.f32.mxu1 %vm2323_vm0, %v2322_v1 }
 0x525   : > { %v1396_v61 = vpop.permute.xlu0 %1395 }
 0x526   : > { %2112 = vmatmul.mubr.msk.f32.gmra.mrb[70].mxu1 %vm1006_vm3, %v1396_v61 }
 0x527   : > { %2114 = vmatprep.mubr.msk.f32.mxu1 %vm2323_vm0, %v2322_v1 }
 0x529   : > { %v1398_v12 = vpop.permute.xlu0 %1397 }
 0x52a   : > { %2115 = vmatmul.mubr.msk.f32.gmra.mrb[72].mxu1 %vm1006_vm3, %v1398_v12 }
 0x577   : > { %v1508_v63 = vpop.f32.mrb[38].mxu1 }
 0x578   : > { %1598 = vst.msk [vmem:[%s3023_s30 + $0x8] sm:$0xff] %vm253_vm1, %v1508_v63  ;;  %v2065_v13 = vpop.f32.mrb[39].mxu1 }
 0x57b   : > { %v1513_v1 = vpop.f32.mrb[40].mxu1 }
 0x57c   : > { %1599 = vst.msk [vmem:[%s3023_s30 + $0x10] sm:$0xff] %vm253_vm1, %v1513_v1  ;;  %v2068_v2 = vpop.f32.mrb[41].mxu1 }
 0x588   : > { %v1518_v14 = vpop.f32.mrb[42].mxu1 }
 0x589   : > { %1600 = vst.msk [vmem:[%s3023_s30 + $0x18] sm:$0xff] %vm253_vm1, %v1518_v14  ;;  %v2071_v5 = vpop.f32.mrb[43].mxu1 }
 0x58c   : > { %v1523_v4 = vpop.f32.mrb[44].mxu1 }
 0x58d   : > { %1601 = vst.msk [vmem:[%s3023_s30 + $0x20] sm:$0xff] %vm253_vm1, %v1523_v4  ;;  %v2074_v15 = vpop.f32.mrb[45].mxu1 }
 0x590   : > { %v1528_v34 = vpop.f32.mrb[46].mxu1 }
 0x591   : > { %1602 = vst.msk [vmem:[%s3023_s30 + $0x28] sm:$0xff] %vm253_vm1, %v1528_v34  ;;  %v2077_v16 = vpop.f32.mrb[47].mxu1 }
 0x594   : > { %v1533_v42 = vpop.f32.mrb[48].mxu1 }
 0x595   : > { %1603 = vst.msk [vmem:[%s3023_s30 + $0x30] sm:$0xff] %vm253_vm1, %v1533_v42  ;;  %v2080_v17 = vpop.f32.mrb[49].mxu1 }
 0x598   : > { %v1538_v19 = vpop.f32.mrb[50].mxu1 }
 0x599   : > { %1604 = vst.msk [vmem:[%s3023_s30 + $0x38] sm:$0xff] %vm253_vm1, %v1538_v19  ;;  %v2083_v20 = vpop.f32.mrb[51].mxu1 }
 0x59c   : > { %v1543_v30 = vpop.f32.mrb[52].mxu1 }
 0x59d   : > { %1605 = vst.msk [vmem:[%s3023_s30 + $0x40] sm:$0xff] %vm253_vm1, %v1543_v30  ;;  %v2086_v46 = vpop.f32.mrb[53].mxu1 }
 0x5a0   : > { %v1548_v18 = vpop.f32.mrb[54].mxu1 }
 0x5a1   : > { %1606 = vst.msk [vmem:[%s3023_s30 + $0x48] sm:$0xff] %vm253_vm1, %v1548_v18  ;;  %v2089_v21 = vpop.f32.mrb[55].mxu1 }
 0x5a4   : > { %v1553_v32 = vpop.f32.mrb[56].mxu1 }
 0x5a5   : > { %1607 = vst.msk [vmem:[%s3023_s30 + $0x50] sm:$0xff] %vm253_vm1, %v1553_v32  ;;  %v2092_v33 = vpop.f32.mrb[57].mxu1 }
 0x5a8   : > { %v1558_v50 = vpop.f32.mrb[58].mxu1 }
 0x5a9   : > { %1608 = vst.msk [vmem:[%s3023_s30 + $0x58] sm:$0xff] %vm253_vm1, %v1558_v50  ;;  %v2095_v22 = vpop.f32.mrb[59].mxu1 }
 0x5ac   : > { %v1563_v35 = vpop.f32.mrb[60].mxu1 }
 0x5ad   : > { %1609 = vst.msk [vmem:[%s3023_s30 + $0x60] sm:$0xff] %vm253_vm1, %v1563_v35  ;;  %v2098_v54 = vpop.f32.mrb[61].mxu1 }
 0x5b0   : > { %v1568_v58 = vpop.f32.mrb[62].mxu1 }
 0x5b1   : > { %1610 = vst.msk [vmem:[%s3023_s30 + $0x68] sm:$0xff] %vm253_vm1, %v1568_v58  ;;  %v2101_v39 = vpop.f32.mrb[63].mxu1 }
 0x5b4   : > { %v1573_v40 = vpop.f32.mrb[64].mxu1 }
 0x5b5   : > { %1611 = vst.msk [vmem:[%s3023_s30 + $0x70] sm:$0xff] %vm253_vm1, %v1573_v40  ;;  %v2104_v62 = vpop.f32.mrb[65].mxu1 }
 0x5b7   : > { %v1503_v3 = vpop.f32.mrb[76].mxu0 }
 0x5b8   : > { %1597 = vst.msk [vmem:[%s3023_s30] sm:$0xff] %vm253_vm1, %v1503_v3  ;;  %v2062_v44 = vpop.f32.mrb[77].mxu0  ;;  %v1578_v27 = vpop.f32.mrb[66].mxu1 }
 0x5b9   : > { %1612 = vst.msk [vmem:[%s3023_s30 + $0x78] sm:$0xff] %vm253_vm1, %v1578_v27  ;;  %v2107_v45 = vpop.f32.mrb[67].mxu1 }
 0x5bc   : > { %v1583_v31 = vpop.f32.mrb[68].mxu1 }
 0x5bd   : > { %1613 = vst.msk [vmem:[%s3023_s30 + $0x80] sm:$0xff] %vm253_vm1, %v1583_v31  ;;  %v2110_v6 = vpop.f32.mrb[69].mxu1 }
 0x5f9   : > { %v1588_v36 = vpop.f32.mrb[70].mxu1 }
 0x5fa   : > { %1614 = vst.msk [vmem:[%s3023_s30 + $0x88] sm:$0xff] %vm253_vm1, %v1588_v36  ;;  %v2113_v25 = vpop.f32.mrb[71].mxu1 }
 0x5fd   : > { %v1593_v48 = vpop.f32.mrb[72].mxu1 }
 0x5fe   : > { %1615 = vst.msk [vmem:[%s3023_s30 + $0x90] sm:$0xff] %vm253_vm1, %v1593_v48  ;;  %v2116_v41 = vpop.f32.mrb[73].mxu1 }
 0x5ff PF: > { %s15_s18 = sadd.s32 1, %s2320_s18  }
 0x600   : > { %p12_p4 = scmp.ge.s32.totalorder %s15_s18, 4  }
 0x602   :  { %14 = sbr.rel (!%p12_p4) target bundleno = 1 (0x1), region = 70 }

</bundles_post_ra>
